<compile_context>
chip_gen: v7x
topology: tpu7x:2x2x1
jax: 0.10.0
libtpu: 0.0.40
codegen_flags: <defaults>
</compile_context>

<pallas_src>
import functools

import jax
import jax.numpy as jnp
from jax import lax
from jax.experimental import pallas as pl
from jax.experimental.pallas import tpu as pltpu

EPS = 1e-5

# Row-tile budget (elements of TH*W per grid step).  Re-derive per generation:
# v5e/v6e can go larger (128 MiB VMEM); v7x should keep effective usage <= ~24-28 MiB/TC.
_MAX_ROW_ELEMS = 2048
_VMEM_LIMIT = 64 * 1024 * 1024


def _pick_row_tile(H, W, max_row_elems=_MAX_ROW_ELEMS):
    """Largest divisor TH of H with TH * W <= max_row_elems (falls back to 1)."""
    best = 1
    for th in range(1, H + 1):
        if H % th == 0 and th * W <= max_row_elems:
            best = th
    return best


# ----------------------------------------------------------------------------
# Kernel A: fused BN1-affine + ReLU + 1x1 conv (matmul), plus per-block partial
# sums (sum, sum-of-squares) of the conv output for BN2 statistics.
# Grid: (N, H // rows_a), both axes "parallel".  Channels-last blocks.
# ----------------------------------------------------------------------------
def _bn1_conv1_kernel(x_ref, s1_ref, t1_ref, w1_ref, o1_ref, st_ref):
    # x_ref:  (1, THa, W, Cin) f32   s1/t1: (1, Cin) f32   w1: (Cin, C4) f32
    # o1_ref: (1, THa, W, C4) bf16   st_ref: (1, 1, 2, C4) f32
    tha, w, cin = x_ref.shape[1], x_ref.shape[2], x_ref.shape[3]
    c4 = w1_ref.shape[1]

    x = x_ref[0].reshape(tha * w, cin)                              # (THa*W, Cin) f32
    h1 = jnp.maximum(x * s1_ref[...] + t1_ref[...], 0.0)           # BN1-affine + ReLU
    o1 = jnp.dot(h1, w1_ref[...], preferred_element_type=jnp.float32)   # f32 MXU matmul

    o1_ref[0] = o1.reshape(tha, w, c4).astype(o1_ref.dtype)        # bf16 store (HBM traffic /2)
    # Two direct stat stores (no concat); computed from the f32 accumulator.
    st_ref[0, 0, 0:1, :] = jnp.sum(o1, axis=0, keepdims=True)
    st_ref[0, 0, 1:2, :] = jnp.sum(o1 * o1, axis=0, keepdims=True)


# ----------------------------------------------------------------------------
# Kernel B: fused BN2-affine + ReLU + 3x3 conv (padding=1), row-tiled with a
# 1-row halo carried by two size-1-row side inputs (clamped index maps) and
# nine accumulated per-tap matmuls (no im2col, no padded scratch, no transpose).
# Grid: (N, H // TH), both axes "parallel".  Channels-last output (TH, W, Cg).
# ----------------------------------------------------------------------------
def _make_bn2_conv2_kernel(TH, W, Cg):
    def kernel(mid_ref, top_ref, bot_ref, s2_ref, t2_ref, w2_ref, out_ref):
        # mid_ref: (1, TH, W, C4) bf16   top/bot: (1, 1, W, C4) bf16
        # s2/t2:   (1, C4) f32           w2: (9, C4, Cgp) f32
        # out_ref: (1, TH, W, Cg) f32
        r = pl.program_id(1)
        nr = pl.num_programs(1)
        c4 = mid_ref.shape[3]
        cgp = w2_ref.shape[2]

        mid = mid_ref[0].astype(jnp.float32)                        # (TH, W, C4)
        top = top_ref[0].astype(jnp.float32)                        # (1,  W, C4)
        bot = bot_ref[0].astype(jnp.float32)                        # (1,  W, C4)
        full = jnp.concatenate([top, mid, bot], axis=0)             # (TH+2, W, C4)

        h2 = jnp.maximum(full * s2_ref[...] + t2_ref[...], 0.0)     # BN2-affine + ReLU (f32)

        # conv padding is applied AFTER bn+relu, so out-of-image halo rows are exact zeros.
        row = lax.broadcasted_iota(jnp.int32, (TH + 2, 1, 1), 0)
        valid = ((row > 0) | (r > 0)) & ((row < TH + 1) | (r < nr - 1))
        h2 = jnp.where(valid, h2, 0.0)

        zcol = jnp.zeros((TH, 1, c4), jnp.float32)
        acc = jnp.zeros((TH * W, cgp), jnp.float32)
        for ky in range(3):
            rows = h2[ky:ky + TH]                                   # (TH, W, C4)
            taps = (
                jnp.concatenate([zcol, rows[:, :W - 1, :]], axis=1),   # kx = 0 (shift right)
                rows,                                                   # kx = 1
                jnp.concatenate([rows[:, 1:, :], zcol], axis=1),        # kx = 2 (shift left)
            )
            for kx in range(3):
                acc = acc + jnp.dot(taps[kx].reshape(TH * W, c4),
                                    w2_ref[ky * 3 + kx],
                                    preferred_element_type=jnp.float32)

        # Slice away the MXU channel padding BEFORE the store (no transpose needed).
        out_ref[0] = acc[:, :Cg].reshape(TH, W, Cg)
    return kernel


# ----------------------------------------------------------------------------
# Channels-last (NHWC) bottleneck forward.  In a full DenseNet the whole graph
# would stay NHWC so the dense-block concat is a lane-axis concat with no
# activation transposes.
# ----------------------------------------------------------------------------
def bottleneck_forward_nhwc(x_nhwc, g1, b1, w1_oihw, g2, b2, w2_oihw,
                            *, rows_a=None, rows_b=None):
    N, H, W, Cin = x_nhwc.shape
    C4 = w1_oihw.shape[0]
    Cg = w2_oihw.shape[0]
    Cgp = ((Cg + 127) // 128) * 128                 # pad conv2 output channels for the MXU
    cnt = float(N * H * W)

    x = x_nhwc.astype(jnp.float32)

    # ---- BN1 batch stats: one fused sum / sum-of-squares pass over x ----
    sx = jnp.sum(x, axis=(0, 1, 2))
    sxx = jnp.sum(x * x, axis=(0, 1, 2))
    m1 = sx / cnt
    v1 = jnp.maximum(sxx / cnt - m1 * m1, 0.0)      # biased, like torch BN train fwd
    inv1 = lax.rsqrt(v1 + EPS)
    s1 = (g1 * inv1).reshape(1, Cin).astype(jnp.float32)
    t1 = (b1 - m1 * g1 * inv1).reshape(1, Cin).astype(jnp.float32)

    w1_mat = jnp.transpose(w1_oihw[:, :, 0, 0], (1, 0)).astype(jnp.float32)   # (Cin, C4)

    if rows_a is None:
        rows_a = _pick_row_tile(H, W)
    assert H % rows_a == 0, (H, rows_a)
    gra = H // rows_a

    o1, stats = pl.pallas_call(
        _bn1_conv1_kernel,
        grid=(N, gra),
        in_specs=[
            pl.BlockSpec((1, rows_a, W, Cin), lambda n, r: (n, r, 0, 0)),
            pl.BlockSpec((1, Cin), lambda n, r: (0, 0)),
            pl.BlockSpec((1, Cin), lambda n, r: (0, 0)),
            pl.BlockSpec((Cin, C4), lambda n, r: (0, 0)),
        ],
        out_specs=(
            pl.BlockSpec((1, rows_a, W, C4), lambda n, r: (n, r, 0, 0)),
            pl.BlockSpec((1, 1, 2, C4), lambda n, r: (n, r, 0, 0)),
        ),
        out_shape=(
            jax.ShapeDtypeStruct((N, H, W, C4), jnp.bfloat16),
            jax.ShapeDtypeStruct((N, gra, 2, C4), jnp.float32),
        ),
        compiler_params=pltpu.CompilerParams(
            dimension_semantics=("parallel", "parallel"),
            vmem_limit_bytes=_VMEM_LIMIT),
        cost_estimate=pl.CostEstimate(
            flops=2 * N * H * W * Cin * C4, transcendentals=0,
            bytes_accessed=N * H * W * (Cin * 4 + C4 * 2)),
    )(x, s1, t1, w1_mat)

    # ---- BN2 batch stats from kernel-A partial sums (no re-read of o1 from HBM) ----
    st = jnp.sum(stats, axis=(0, 1))                # (2, C4)
    m2 = st[0] / cnt
    v2 = jnp.maximum(st[1] / cnt - m2 * m2, 0.0)
    inv2 = lax.rsqrt(v2 + EPS)
    s2 = (g2 * inv2).reshape(1, C4).astype(jnp.float32)
    t2 = (b2 - m2 * g2 * inv2).reshape(1, C4).astype(jnp.float32)

    # 3x3 weights, tap-major (ky*3+kx), output channels zero-padded to a lane multiple.
    w2_mat = jnp.transpose(w2_oihw, (2, 3, 1, 0)).reshape(9, C4, Cg)
    w2_pad = jnp.pad(w2_mat, ((0, 0), (0, 0), (0, Cgp - Cg))).astype(jnp.float32)

    if rows_b is None:
        rows_b = _pick_row_tile(H, W)
    assert H % rows_b == 0, (H, rows_b)
    grb = H // rows_b
    TH = rows_b

    out = pl.pallas_call(
        _make_bn2_conv2_kernel(TH, W, Cg),
        grid=(N, grb),
        in_specs=[
            # center rows of the tile
            pl.BlockSpec((1, TH, W, C4), lambda n, r: (n, r, 0, 0)),
            # 1-row halos: row-block size 1 => block index == row index; clamp at edges,
            # the invalid edge halo is zeroed inside the kernel.
            pl.BlockSpec((1, 1, W, C4),
                         lambda n, r: (n, jnp.maximum(r * TH - 1, 0), 0, 0)),
            pl.BlockSpec((1, 1, W, C4),
                         lambda n, r: (n, jnp.minimum(r * TH + TH, H - 1), 0, 0)),
            pl.BlockSpec((1, C4), lambda n, r: (0, 0)),
            pl.BlockSpec((1, C4), lambda n, r: (0, 0)),
            pl.BlockSpec((9, C4, Cgp), lambda n, r: (0, 0, 0)),
        ],
        out_specs=pl.BlockSpec((1, TH, W, Cg), lambda n, r: (n, r, 0, 0)),
        out_shape=jax.ShapeDtypeStruct((N, H, W, Cg), jnp.float32),
        compiler_params=pltpu.CompilerParams(
            dimension_semantics=("parallel", "parallel"),
            vmem_limit_bytes=_VMEM_LIMIT),
        cost_estimate=pl.CostEstimate(
            flops=2 * N * H * W * 9 * C4 * Cgp, transcendentals=0,
            bytes_accessed=N * H * W * (C4 * 2 + Cg * 4)),
    )(o1, o1, o1, s2, t2, w2_pad)

    # torch.cat([out, x], dim=1)  ==  channels-last concat on the lane axis.
    return jnp.concatenate([out, x_nhwc.astype(jnp.float32)], axis=-1)


def bottleneck_forward(x_nchw, g1, b1, w1, g2, b2, w2, *, rows_a=None, rows_b=None):
    """NCHW in, NCHW out (channel order [conv2_out, x], like torch.cat)."""
    # TODO(synk): in a full DenseNet keep activations NHWC end-to-end and drop these
    #             boundary transposes entirely.
    x_nhwc = jnp.transpose(x_nchw, (0, 2, 3, 1))
    y = bottleneck_forward_nhwc(x_nhwc, g1, b1, w1, g2, b2, w2,
                                rows_a=rows_a, rows_b=rows_b)
    return jnp.transpose(y, (0, 3, 1, 2))


# ----------------------------------------------------------------------------
# Reference: same math in plain XLA.  o1 is rounded through bf16 (matching the
# kernel's bf16 intermediate storage); BN2 stats are taken from the f32 o1,
# exactly as the kernel does.
# ----------------------------------------------------------------------------
def _reference(x, g1, b1, w1, g2, b2, w2):
    def bn_stats(z):
        m = jnp.mean(z, axis=(0, 2, 3), keepdims=True)
        v = jnp.var(z, axis=(0, 2, 3), keepdims=True)   # biased, like torch BN train fwd
        return m, v

    m1, v1 = bn_stats(x)
    h1 = jax.nn.relu((x - m1) * lax.rsqrt(v1 + EPS) * g1.reshape(1, -1, 1, 1)
                     + b1.reshape(1, -1, 1, 1))
    o1 = lax.conv_general_dilated(h1, w1, (1, 1), 'VALID',
                                  dimension_numbers=('NCHW', 'OIHW', 'NCHW'))
    m2, v2 = bn_stats(o1)                               # stats from f32 o1 (as in the kernel)
    o1b = o1.astype(jnp.bfloat16).astype(jnp.float32)   # kernel stores o1 in bf16
    h2 = jax.nn.relu((o1b - m2) * lax.rsqrt(v2 + EPS) * g2.reshape(1, -1, 1, 1)
                     + b2.reshape(1, -1, 1, 1))
    o2 = lax.conv_general_dilated(h2, w2, (1, 1), ((1, 1), (1, 1)),
                                  dimension_numbers=('NCHW', 'OIHW', 'NCHW'))
    return jnp.concatenate([o2, x], axis=1)


if __name__ == "__main__":
    N, Cin, H, W = 2, 4, 16, 16
    growth = 8
    C4, Cg = 4 * growth, growth

    key = jax.random.PRNGKey(0)
    kx, k1, k2, k3, k4, k5, k6 = jax.random.split(key, 7)

    x = jax.random.normal(kx, (N, Cin, H, W), jnp.float32)
    g1 = 1.0 + 0.1 * jax.random.normal(k1, (Cin,), jnp.float32)
    b1 = 0.1 * jax.random.normal(k2, (Cin,), jnp.float32)
    w1 = jax.random.normal(k3, (C4, Cin, 1, 1), jnp.float32) / jnp.sqrt(Cin)
    g2 = 1.0 + 0.1 * jax.random.normal(k4, (C4,), jnp.float32)
    b2 = 0.1 * jax.random.normal(k5, (C4,), jnp.float32)
    w2 = jax.random.normal(k6, (Cg, C4, 3, 3), jnp.float32) / jnp.sqrt(9.0 * C4)

    ref = jax.block_until_ready(_reference(x, g1, b1, w1, g2, b2, w2))

    # 1) Explicit small row tiles: exercises the 1-row halo exchange (4 row blocks)
    #    and the multi-block BN2 partial-sum reduction.
    fwd_tiled = jax.jit(functools.partial(bottleneck_forward, rows_a=4, rows_b=4))
    out_tiled = jax.block_until_ready(fwd_tiled(x, g1, b1, w1, g2, b2, w2))
    assert out_tiled.shape == (N, Cg + Cin, H, W), out_tiled.shape
    err = float(jnp.max(jnp.abs(out_tiled - ref)))
    assert jnp.allclose(out_tiled, ref, rtol=3e-3, atol=3e-3), err

    # 2) Auto tiling (whole image per grid step at this tiny size).
    fwd_auto = jax.jit(bottleneck_forward)
    out_auto = jax.block_until_ready(fwd_auto(x, g1, b1, w1, g2, b2, w2))
    err = float(jnp.max(jnp.abs(out_auto - ref)))
    assert jnp.allclose(out_auto, ref, rtol=3e-3, atol=3e-3), err

    print("KERNEL_OK")
</pallas_src>

<mosaic_0001>
module attributes {stable_mosaic.version = 11 : i64} {
  func.func @_bn1_conv1_kernel(%arg0: i32, %arg1: i32, %arg2: memref<1x4x16x4xf32, #tpu.memory_space<vmem>>, %arg3: memref<1x4xf32, #tpu.memory_space<vmem>>, %arg4: memref<1x4xf32, #tpu.memory_space<vmem>>, %arg5: memref<4x32xf32, #tpu.memory_space<vmem>>, %arg6: memref<1x4x16x32xbf16, #tpu.memory_space<vmem>>, %arg7: memref<1x1x2x32xf32, #tpu.memory_space<vmem>>) attributes {dimension_semantics = [#tpu.dimension_semantics<parallel>, #tpu.dimension_semantics<parallel>], iteration_bounds = array<i64: 2, 4>, scalar_prefetch = 0 : i64, scratch_operands = 0 : i64, tpu.core_type = #tpu.core_type<tc>, window_params = [{transform_indices = @transform_0, window_bounds = array<i64: 1, 4, 16, 4>}, {pipeline_mode = #tpu.pipeline_mode<synchronous>, transform_indices = @transform_1, window_bounds = array<i64: 1, 4>}, {pipeline_mode = #tpu.pipeline_mode<synchronous>, transform_indices = @transform_2, window_bounds = array<i64: 1, 4>}, {pipeline_mode = #tpu.pipeline_mode<synchronous>, transform_indices = @transform_3, window_bounds = array<i64: 4, 32>}, {transform_indices = @transform_4, window_bounds = array<i64: 1, 4, 16, 32>}, {transform_indices = @transform_5, window_bounds = array<i64: 1, 1, 2, 32>}]} {
    %c0 = arith.constant 0 : index
    %c0_0 = arith.constant 0 : index
    %c0_1 = arith.constant 0 : index
    %c0_2 = arith.constant 0 : index
    %0 = vector.load %arg2[%c0, %c0_0, %c0_1, %c0_2] : memref<1x4x16x4xf32, #tpu.memory_space<vmem>>, vector<1x4x16x4xf32>
    %1 = vector.shape_cast %0 : vector<1x4x16x4xf32> to vector<4x16x4xf32>
    %2 = vector.shape_cast %1 : vector<4x16x4xf32> to vector<64x4xf32>
    %c0_3 = arith.constant 0 : index
    %c0_4 = arith.constant 0 : index
    %3 = vector.load %arg3[%c0_3, %c0_4] : memref<1x4xf32, #tpu.memory_space<vmem>>, vector<1x4xf32>
    %4 = vector.broadcast %3 : vector<1x4xf32> to vector<64x4xf32>
    %5 = arith.mulf %2, %4 : vector<64x4xf32>
    %c0_5 = arith.constant 0 : index
    %c0_6 = arith.constant 0 : index
    %6 = vector.load %arg4[%c0_5, %c0_6] : memref<1x4xf32, #tpu.memory_space<vmem>>, vector<1x4xf32>
    %7 = vector.broadcast %6 : vector<1x4xf32> to vector<64x4xf32>
    %8 = arith.addf %5, %7 : vector<64x4xf32>
    %cst = arith.constant 0.000000e+00 : f32
    %9 = vector.broadcast %cst : f32 to vector<64x4xf32>
    %10 = arith.maximumf %8, %9 : vector<64x4xf32>
    %c0_7 = arith.constant 0 : index
    %c0_8 = arith.constant 0 : index
    %11 = vector.load %arg5[%c0_7, %c0_8] : memref<4x32xf32, #tpu.memory_space<vmem>>, vector<4x32xf32>
    %cst_9 = arith.constant dense<0.000000e+00> : vector<64x32xf32>
    %12 = tpu.matmul %10, %11, %cst_9 {dimension_numbers = #tpu.dot_dimension_numbers<[1], [0], [0], [1], [0, 0, 1, 1], [], []>} : vector<64x4xf32>, vector<4x32xf32>, vector<64x32xf32> -> vector<64x32xf32>
    %13 = vector.shape_cast %12 : vector<64x32xf32> to vector<4x16x32xf32>
    %14 = arith.truncf %13 : vector<4x16x32xf32> to vector<4x16x32xbf16>
    %c0_10 = arith.constant 0 : index
    %c0_11 = arith.constant 0 : index
    %c0_12 = arith.constant 0 : index
    %c0_13 = arith.constant 0 : index
    %15 = vector.load %arg6[%c0_10, %c0_11, %c0_12, %c0_13] : memref<1x4x16x32xbf16, #tpu.memory_space<vmem>>, vector<1x4x16x32xbf16>
    %16 = vector.shape_cast %15 : vector<1x4x16x32xbf16> to vector<4x16x32xbf16>
    %17 = vector.shape_cast %14 : vector<4x16x32xbf16> to vector<1x4x16x32xbf16>
    tpu.vector_store %arg6[%c0_10, %c0_11, %c0_12, %c0_13], %17 {strides = array<i32>} : memref<1x4x16x32xbf16, #tpu.memory_space<vmem>>, vector<1x4x16x32xbf16>,
    %cst_14 = arith.constant dense<0.000000e+00> : vector<32xf32>
    %18 = vector.multi_reduction <add>, %12, %cst_14 [0] : vector<64x32xf32> to vector<32xf32>
    %19 = vector.shape_cast %18 : vector<32xf32> to vector<1x32xf32>
    %c0_15 = arith.constant 0 : index
    %c0_16 = arith.constant 0 : index
    %c0_17 = arith.constant 0 : index
    %c0_18 = arith.constant 0 : index
    %20 = vector.load %arg7[%c0_15, %c0_16, %c0_17, %c0_18] : memref<1x1x2x32xf32, #tpu.memory_space<vmem>>, vector<1x1x1x32xf32>
    %21 = vector.shape_cast %20 : vector<1x1x1x32xf32> to vector<1x32xf32>
    %22 = vector.shape_cast %19 : vector<1x32xf32> to vector<1x1x1x32xf32>
    tpu.vector_store %arg7[%c0_15, %c0_16, %c0_17, %c0_18], %22 {strides = array<i32>} : memref<1x1x2x32xf32, #tpu.memory_space<vmem>>, vector<1x1x1x32xf32>,
    %23 = arith.mulf %12, %12 : vector<64x32xf32>
    %cst_19 = arith.constant dense<0.000000e+00> : vector<32xf32>
    %24 = vector.multi_reduction <add>, %23, %cst_19 [0] : vector<64x32xf32> to vector<32xf32>
    %25 = vector.shape_cast %24 : vector<32xf32> to vector<1x32xf32>
    %c0_20 = arith.constant 0 : index
    %c0_21 = arith.constant 0 : index
    %c1 = arith.constant 1 : index
    %c0_22 = arith.constant 0 : index
    %26 = vector.load %arg7[%c0_20, %c0_21, %c1, %c0_22] : memref<1x1x2x32xf32, #tpu.memory_space<vmem>>, vector<1x1x1x32xf32>
    %27 = vector.shape_cast %26 : vector<1x1x1x32xf32> to vector<1x32xf32>
    %28 = vector.shape_cast %25 : vector<1x32xf32> to vector<1x1x1x32xf32>
    tpu.vector_store %arg7[%c0_20, %c0_21, %c1, %c0_22], %28 {strides = array<i32>} : memref<1x1x2x32xf32, #tpu.memory_space<vmem>>, vector<1x1x1x32xf32>,
    return
  }
  func.func @transform_0(%arg0: i32, %arg1: i32) -> (i32, i32, i32, i32) {
    %c0_i32 = arith.constant 0 : i32
    %c0_i32_0 = arith.constant 0 : i32
    %c0_i32_1 = arith.constant 0 : i32
    return %arg0, %arg1, %c0_i32, %c0_i32_0 : i32, i32, i32, i32
  }
  func.func @transform_1(%arg0: i32, %arg1: i32) -> (i32, i32) {
    %c0_i32 = arith.constant 0 : i32
    %c0_i32_0 = arith.constant 0 : i32
    %c0_i32_1 = arith.constant 0 : i32
    return %c0_i32, %c0_i32_0 : i32, i32
  }
  func.func @transform_2(%arg0: i32, %arg1: i32) -> (i32, i32) {
    %c0_i32 = arith.constant 0 : i32
    %c0_i32_0 = arith.constant 0 : i32
    %c0_i32_1 = arith.constant 0 : i32
    return %c0_i32, %c0_i32_0 : i32, i32
  }
  func.func @transform_3(%arg0: i32, %arg1: i32) -> (i32, i32) {
    %c0_i32 = arith.constant 0 : i32
    %c0_i32_0 = arith.constant 0 : i32
    %c0_i32_1 = arith.constant 0 : i32
    return %c0_i32, %c0_i32_0 : i32, i32
  }
  func.func @transform_4(%arg0: i32, %arg1: i32) -> (i32, i32, i32, i32) {
    %c0_i32 = arith.constant 0 : i32
    %c0_i32_0 = arith.constant 0 : i32
    %c0_i32_1 = arith.constant 0 : i32
    return %arg0, %arg1, %c0_i32, %c0_i32_0 : i32, i32, i32, i32
  }
  func.func @transform_5(%arg0: i32, %arg1: i32) -> (i32, i32, i32, i32) {
    %c0_i32 = arith.constant 0 : i32
    %c0_i32_0 = arith.constant 0 : i32
    %c0_i32_1 = arith.constant 0 : i32
    return %arg0, %arg1, %c0_i32, %c0_i32_0 : i32, i32, i32, i32
  }
}

module attributes {stable_mosaic.version = 11 : i64} {
  func.func @kernel(%arg0: i32, %arg1: i32, %arg2: memref<1x4x16x32xbf16, #tpu.memory_space<vmem>>, %arg3: memref<1x1x16x32xbf16, #tpu.memory_space<vmem>>, %arg4: memref<1x1x16x32xbf16, #tpu.memory_space<vmem>>, %arg5: memref<1x32xf32, #tpu.memory_space<vmem>>, %arg6: memref<1x32xf32, #tpu.memory_space<vmem>>, %arg7: memref<9x32x128xf32, #tpu.memory_space<vmem>>, %arg8: memref<1x4x16x8xf32, #tpu.memory_space<vmem>>) attributes {dimension_semantics = [#tpu.dimension_semantics<parallel>, #tpu.dimension_semantics<parallel>], iteration_bounds = array<i64: 2, 4>, scalar_prefetch = 0 : i64, scratch_operands = 0 : i64, tpu.core_type = #tpu.core_type<tc>, window_params = [{transform_indices = @transform_0, window_bounds = array<i64: 1, 4, 16, 32>}, {transform_indices = @transform_1, window_bounds = array<i64: 1, 1, 16, 32>}, {transform_indices = @transform_2, window_bounds = array<i64: 1, 1, 16, 32>}, {pipeline_mode = #tpu.pipeline_mode<synchronous>, transform_indices = @transform_3, window_bounds = array<i64: 1, 32>}, {pipeline_mode = #tpu.pipeline_mode<synchronous>, transform_indices = @transform_4, window_bounds = array<i64: 1, 32>}, {pipeline_mode = #tpu.pipeline_mode<synchronous>, transform_indices = @transform_5, window_bounds = array<i64: 9, 32, 128>}, {transform_indices = @transform_6, window_bounds = array<i64: 1, 4, 16, 8>}]} {
    %c0 = arith.constant 0 : index
    %c0_0 = arith.constant 0 : index
    %c0_1 = arith.constant 0 : index
    %c0_2 = arith.constant 0 : index
    %0 = vector.load %arg2[%c0, %c0_0, %c0_1, %c0_2] : memref<1x4x16x32xbf16, #tpu.memory_space<vmem>>, vector<1x4x16x32xbf16>
    %1 = vector.shape_cast %0 : vector<1x4x16x32xbf16> to vector<4x16x32xbf16>
    %2 = arith.extf %1 : vector<4x16x32xbf16> to vector<4x16x32xf32>
    %c0_3 = arith.constant 0 : index
    %c0_4 = arith.constant 0 : index
    %c0_5 = arith.constant 0 : index
    %c0_6 = arith.constant 0 : index
    %3 = vector.load %arg3[%c0_3, %c0_4, %c0_5, %c0_6] : memref<1x1x16x32xbf16, #tpu.memory_space<vmem>>, vector<1x1x16x32xbf16>
    %4 = vector.shape_cast %3 : vector<1x1x16x32xbf16> to vector<1x16x32xbf16>
    %5 = arith.extf %4 : vector<1x16x32xbf16> to vector<1x16x32xf32>
    %c0_7 = arith.constant 0 : index
    %c0_8 = arith.constant 0 : index
    %c0_9 = arith.constant 0 : index
    %c0_10 = arith.constant 0 : index
    %6 = vector.load %arg4[%c0_7, %c0_8, %c0_9, %c0_10] : memref<1x1x16x32xbf16, #tpu.memory_space<vmem>>, vector<1x1x16x32xbf16>
    %7 = vector.shape_cast %6 : vector<1x1x16x32xbf16> to vector<1x16x32xbf16>
    %8 = arith.extf %7 : vector<1x16x32xbf16> to vector<1x16x32xf32>
    %9 = tpu.concatenate %5, %2, %8 in 0 : vector<1x16x32xf32>, vector<4x16x32xf32>, vector<1x16x32xf32> -> vector<6x16x32xf32>
    %c0_11 = arith.constant 0 : index
    %c0_12 = arith.constant 0 : index
    %10 = vector.load %arg5[%c0_11, %c0_12] : memref<1x32xf32, #tpu.memory_space<vmem>>, vector<1x32xf32>
    %11 = vector.shape_cast %10 : vector<1x32xf32> to vector<1x1x32xf32>
    %12 = vector.broadcast %11 : vector<1x1x32xf32> to vector<6x16x32xf32>
    %13 = arith.mulf %9, %12 : vector<6x16x32xf32>
    %c0_13 = arith.constant 0 : index
    %c0_14 = arith.constant 0 : index
    %14 = vector.load %arg6[%c0_13, %c0_14] : memref<1x32xf32, #tpu.memory_space<vmem>>, vector<1x32xf32>
    %15 = vector.shape_cast %14 : vector<1x32xf32> to vector<1x1x32xf32>
    %16 = vector.broadcast %15 : vector<1x1x32xf32> to vector<6x16x32xf32>
    %17 = arith.addf %13, %16 : vector<6x16x32xf32>
    %cst = arith.constant 0.000000e+00 : f32
    %18 = vector.broadcast %cst : f32 to vector<6x16x32xf32>
    %19 = arith.maximumf %17, %18 : vector<6x16x32xf32>
    %20 = tpu.iota {dimensions = array<i32: 0>} : vector<6x1x1xi32>
    %c0_i32 = arith.constant 0 : i32
    %21 = vector.broadcast %c0_i32 : i32 to vector<6x1x1xi32>
    %22 = arith.cmpi sgt, %20, %21 : vector<6x1x1xi32>
    %c0_i32_15 = arith.constant 0 : i32
    %23 = arith.cmpi sgt, %arg1, %c0_i32_15 : i32
    %24 = vector.broadcast %23 : i1 to vector<6x1x1xi1>
    %25 = arith.ori %22, %24 : vector<6x1x1xi1>
    %c5_i32 = arith.constant 5 : i32
    %26 = vector.broadcast %c5_i32 : i32 to vector<6x1x1xi32>
    %27 = arith.cmpi slt, %20, %26 : vector<6x1x1xi32>
    %c3_i32 = arith.constant 3 : i32
    %28 = arith.cmpi slt, %arg1, %c3_i32 : i32
    %29 = vector.broadcast %28 : i1 to vector<6x1x1xi1>
    %30 = arith.ori %27, %29 : vector<6x1x1xi1>
    %31 = arith.andi %25, %30 : vector<6x1x1xi1>
    %cst_16 = arith.constant 0.000000e+00 : f32
    %32 = vector.shape_cast %31 : vector<6x1x1xi1> to vector<6x1x1xi1>
    %33 = vector.broadcast %32 : vector<6x1x1xi1> to vector<6x16x32xi1>
    %34 = vector.broadcast %cst_16 : f32 to vector<6x16x32xf32>
    %35 = arith.select %33, %19, %34 : vector<6x16x32xi1>, vector<6x16x32xf32>
    %cst_17 = arith.constant 0.000000e+00 : f32
    %36 = vector.broadcast %cst_17 : f32 to vector<4x1x32xf32>
    %cst_18 = arith.constant 0.000000e+00 : f32
    %37 = vector.broadcast %cst_18 : f32 to vector<64x128xf32>
    %38 = vector.extract_strided_slice %35 {offsets = [0, 0, 0], sizes = [4, 16, 32], strides = [1, 1, 1]} : vector<6x16x32xf32> to vector<4x16x32xf32>
    %39 = vector.extract_strided_slice %38 {offsets = [0, 0, 0], sizes = [4, 15, 32], strides = [1, 1, 1]} : vector<4x16x32xf32> to vector<4x15x32xf32>
    %40 = tpu.concatenate %36, %39 in 1 : vector<4x1x32xf32>, vector<4x15x32xf32> -> vector<4x16x32xf32>
    %41 = vector.extract_strided_slice %38 {offsets = [0, 1, 0], sizes = [4, 15, 32], strides = [1, 1, 1]} : vector<4x16x32xf32> to vector<4x15x32xf32>
    %42 = tpu.concatenate %41, %36 in 1 : vector<4x15x32xf32>, vector<4x1x32xf32> -> vector<4x16x32xf32>
    %43 = vector.shape_cast %40 : vector<4x16x32xf32> to vector<64x32xf32>
    %c0_19 = arith.constant 0 : index
    %c0_20 = arith.constant 0 : index
    %c0_21 = arith.constant 0 : index
    %44 = vector.load %arg7[%c0_19, %c0_20, %c0_21] : memref<9x32x128xf32, #tpu.memory_space<vmem>>, vector<1x32x128xf32>
    %45 = vector.shape_cast %44 : vector<1x32x128xf32> to vector<32x128xf32>
    %cst_22 = arith.constant dense<0.000000e+00> : vector<64x128xf32>
    %46 = tpu.matmul %43, %45, %cst_22 {dimension_numbers = #tpu.dot_dimension_numbers<[1], [0], [0], [1], [0, 0, 1, 1], [], []>} : vector<64x32xf32>, vector<32x128xf32>, vector<64x128xf32> -> vector<64x128xf32>
    %47 = arith.addf %37, %46 : vector<64x128xf32>
    %48 = vector.shape_cast %38 : vector<4x16x32xf32> to vector<64x32xf32>
    %c1 = arith.constant 1 : index
    %c0_23 = arith.constant 0 : index
    %c0_24 = arith.constant 0 : index
    %49 = vector.load %arg7[%c1, %c0_23, %c0_24] : memref<9x32x128xf32, #tpu.memory_space<vmem>>, vector<1x32x128xf32>
    %50 = vector.shape_cast %49 : vector<1x32x128xf32> to vector<32x128xf32>
    %cst_25 = arith.constant dense<0.000000e+00> : vector<64x128xf32>
    %51 = tpu.matmul %48, %50, %cst_25 {dimension_numbers = #tpu.dot_dimension_numbers<[1], [0], [0], [1], [0, 0, 1, 1], [], []>} : vector<64x32xf32>, vector<32x128xf32>, vector<64x128xf32> -> vector<64x128xf32>
    %52 = arith.addf %47, %51 : vector<64x128xf32>
    %53 = vector.shape_cast %42 : vector<4x16x32xf32> to vector<64x32xf32>
    %c2 = arith.constant 2 : index
    %c0_26 = arith.constant 0 : index
    %c0_27 = arith.constant 0 : index
    %54 = vector.load %arg7[%c2, %c0_26, %c0_27] : memref<9x32x128xf32, #tpu.memory_space<vmem>>, vector<1x32x128xf32>
    %55 = vector.shape_cast %54 : vector<1x32x128xf32> to vector<32x128xf32>
    %cst_28 = arith.constant dense<0.000000e+00> : vector<64x128xf32>
    %56 = tpu.matmul %53, %55, %cst_28 {dimension_numbers = #tpu.dot_dimension_numbers<[1], [0], [0], [1], [0, 0, 1, 1], [], []>} : vector<64x32xf32>, vector<32x128xf32>, vector<64x128xf32> -> vector<64x128xf32>
    %57 = arith.addf %52, %56 : vector<64x128xf32>
    %58 = vector.extract_strided_slice %35 {offsets = [1, 0, 0], sizes = [4, 16, 32], strides = [1, 1, 1]} : vector<6x16x32xf32> to vector<4x16x32xf32>
    %59 = vector.extract_strided_slice %58 {offsets = [0, 0, 0], sizes = [4, 15, 32], strides = [1, 1, 1]} : vector<4x16x32xf32> to vector<4x15x32xf32>
    %60 = tpu.concatenate %36, %59 in 1 : vector<4x1x32xf32>, vector<4x15x32xf32> -> vector<4x16x32xf32>
    %61 = vector.extract_strided_slice %58 {offsets = [0, 1, 0], sizes = [4, 15, 32], strides = [1, 1, 1]} : vector<4x16x32xf32> to vector<4x15x32xf32>
    %62 = tpu.concatenate %61, %36 in 1 : vector<4x15x32xf32>, vector<4x1x32xf32> -> vector<4x16x32xf32>
    %63 = vector.shape_cast %60 : vector<4x16x32xf32> to vector<64x32xf32>
    %c3 = arith.constant 3 : index
    %c0_29 = arith.constant 0 : index
    %c0_30 = arith.constant 0 : index
    %64 = vector.load %arg7[%c3, %c0_29, %c0_30] : memref<9x32x128xf32, #tpu.memory_space<vmem>>, vector<1x32x128xf32>
    %65 = vector.shape_cast %64 : vector<1x32x128xf32> to vector<32x128xf32>
    %cst_31 = arith.constant dense<0.000000e+00> : vector<64x128xf32>
    %66 = tpu.matmul %63, %65, %cst_31 {dimension_numbers = #tpu.dot_dimension_numbers<[1], [0], [0], [1], [0, 0, 1, 1], [], []>} : vector<64x32xf32>, vector<32x128xf32>, vector<64x128xf32> -> vector<64x128xf32>
    %67 = arith.addf %57, %66 : vector<64x128xf32>
    %68 = vector.shape_cast %58 : vector<4x16x32xf32> to vector<64x32xf32>
    %c4 = arith.constant 4 : index
    %c0_32 = arith.constant 0 : index
    %c0_33 = arith.constant 0 : index
    %69 = vector.load %arg7[%c4, %c0_32, %c0_33] : memref<9x32x128xf32, #tpu.memory_space<vmem>>, vector<1x32x128xf32>
    %70 = vector.shape_cast %69 : vector<1x32x128xf32> to vector<32x128xf32>
    %cst_34 = arith.constant dense<0.000000e+00> : vector<64x128xf32>
    %71 = tpu.matmul %68, %70, %cst_34 {dimension_numbers = #tpu.dot_dimension_numbers<[1], [0], [0], [1], [0, 0, 1, 1], [], []>} : vector<64x32xf32>, vector<32x128xf32>, vector<64x128xf32> -> vector<64x128xf32>
    %72 = arith.addf %67, %71 : vector<64x128xf32>
    %73 = vector.shape_cast %62 : vector<4x16x32xf32> to vector<64x32xf32>
    %c5 = arith.constant 5 : index
    %c0_35 = arith.constant 0 : index
    %c0_36 = arith.constant 0 : index
    %74 = vector.load %arg7[%c5, %c0_35, %c0_36] : memref<9x32x128xf32, #tpu.memory_space<vmem>>, vector<1x32x128xf32>
    %75 = vector.shape_cast %74 : vector<1x32x128xf32> to vector<32x128xf32>
    %cst_37 = arith.constant dense<0.000000e+00> : vector<64x128xf32>
    %76 = tpu.matmul %73, %75, %cst_37 {dimension_numbers = #tpu.dot_dimension_numbers<[1], [0], [0], [1], [0, 0, 1, 1], [], []>} : vector<64x32xf32>, vector<32x128xf32>, vector<64x128xf32> -> vector<64x128xf32>
    %77 = arith.addf %72, %76 : vector<64x128xf32>
    %78 = vector.extract_strided_slice %35 {offsets = [2, 0, 0], sizes = [4, 16, 32], strides = [1, 1, 1]} : vector<6x16x32xf32> to vector<4x16x32xf32>
    %79 = vector.extract_strided_slice %78 {offsets = [0, 0, 0], sizes = [4, 15, 32], strides = [1, 1, 1]} : vector<4x16x32xf32> to vector<4x15x32xf32>
    %80 = tpu.concatenate %36, %79 in 1 : vector<4x1x32xf32>, vector<4x15x32xf32> -> vector<4x16x32xf32>
    %81 = vector.extract_strided_slice %78 {offsets = [0, 1, 0], sizes = [4, 15, 32], strides = [1, 1, 1]} : vector<4x16x32xf32> to vector<4x15x32xf32>
    %82 = tpu.concatenate %81, %36 in 1 : vector<4x15x32xf32>, vector<4x1x32xf32> -> vector<4x16x32xf32>
    %83 = vector.shape_cast %80 : vector<4x16x32xf32> to vector<64x32xf32>
    %c6 = arith.constant 6 : index
    %c0_38 = arith.constant 0 : index
    %c0_39 = arith.constant 0 : index
    %84 = vector.load %arg7[%c6, %c0_38, %c0_39] : memref<9x32x128xf32, #tpu.memory_space<vmem>>, vector<1x32x128xf32>
    %85 = vector.shape_cast %84 : vector<1x32x128xf32> to vector<32x128xf32>
    %cst_40 = arith.constant dense<0.000000e+00> : vector<64x128xf32>
    %86 = tpu.matmul %83, %85, %cst_40 {dimension_numbers = #tpu.dot_dimension_numbers<[1], [0], [0], [1], [0, 0, 1, 1], [], []>} : vector<64x32xf32>, vector<32x128xf32>, vector<64x128xf32> -> vector<64x128xf32>
    %87 = arith.addf %77, %86 : vector<64x128xf32>
    %88 = vector.shape_cast %78 : vector<4x16x32xf32> to vector<64x32xf32>
    %c7 = arith.constant 7 : index
    %c0_41 = arith.constant 0 : index
    %c0_42 = arith.constant 0 : index
    %89 = vector.load %arg7[%c7, %c0_41, %c0_42] : memref<9x32x128xf32, #tpu.memory_space<vmem>>, vector<1x32x128xf32>
    %90 = vector.shape_cast %89 : vector<1x32x128xf32> to vector<32x128xf32>
    %cst_43 = arith.constant dense<0.000000e+00> : vector<64x128xf32>
    %91 = tpu.matmul %88, %90, %cst_43 {dimension_numbers = #tpu.dot_dimension_numbers<[1], [0], [0], [1], [0, 0, 1, 1], [], []>} : vector<64x32xf32>, vector<32x128xf32>, vector<64x128xf32> -> vector<64x128xf32>
    %92 = arith.addf %87, %91 : vector<64x128xf32>
    %93 = vector.shape_cast %82 : vector<4x16x32xf32> to vector<64x32xf32>
    %c8 = arith.constant 8 : index
    %c0_44 = arith.constant 0 : index
    %c0_45 = arith.constant 0 : index
    %94 = vector.load %arg7[%c8, %c0_44, %c0_45] : memref<9x32x128xf32, #tpu.memory_space<vmem>>, vector<1x32x128xf32>
    %95 = vector.shape_cast %94 : vector<1x32x128xf32> to vector<32x128xf32>
    %cst_46 = arith.constant dense<0.000000e+00> : vector<64x128xf32>
    %96 = tpu.matmul %93, %95, %cst_46 {dimension_numbers = #tpu.dot_dimension_numbers<[1], [0], [0], [1], [0, 0, 1, 1], [], []>} : vector<64x32xf32>, vector<32x128xf32>, vector<64x128xf32> -> vector<64x128xf32>
    %97 = arith.addf %92, %96 : vector<64x128xf32>
    %98 = vector.extract_strided_slice %97 {offsets = [0, 0], sizes = [64, 8], strides = [1, 1]} : vector<64x128xf32> to vector<64x8xf32>
    %99 = vector.shape_cast %98 : vector<64x8xf32> to vector<4x16x8xf32>
    %c0_47 = arith.constant 0 : index
    %c0_48 = arith.constant 0 : index
    %c0_49 = arith.constant 0 : index
    %c0_50 = arith.constant 0 : index
    %100 = vector.load %arg8[%c0_47, %c0_48, %c0_49, %c0_50] : memref<1x4x16x8xf32, #tpu.memory_space<vmem>>, vector<1x4x16x8xf32>
    %101 = vector.shape_cast %100 : vector<1x4x16x8xf32> to vector<4x16x8xf32>
    %102 = vector.shape_cast %99 : vector<4x16x8xf32> to vector<1x4x16x8xf32>
    tpu.vector_store %arg8[%c0_47, %c0_48, %c0_49, %c0_50], %102 {strides = array<i32>} : memref<1x4x16x8xf32, #tpu.memory_space<vmem>>, vector<1x4x16x8xf32>,
    return
  }
  func.func @transform_0(%arg0: i32, %arg1: i32) -> (i32, i32, i32, i32) {
    %c0_i32 = arith.constant 0 : i32
    %c0_i32_0 = arith.constant 0 : i32
    %c0_i32_1 = arith.constant 0 : i32
    return %arg0, %arg1, %c0_i32, %c0_i32_0 : i32, i32, i32, i32
  }
  func.func @transform_1(%arg0: i32, %arg1: i32) -> (i32, i32, i32, i32) {
    %c4_i32 = arith.constant 4 : i32
    %0 = arith.muli %arg1, %c4_i32 : i32
    %c1_i32 = arith.constant 1 : i32
    %1 = arith.subi %0, %c1_i32 : i32
    %c0_i32 = arith.constant 0 : i32
    %2 = arith.maxsi %1, %c0_i32 : i32
    %c0_i32_0 = arith.constant 0 : i32
    %c0_i32_1 = arith.constant 0 : i32
    %c0_i32_2 = arith.constant 0 : i32
    return %arg0, %2, %c0_i32_0, %c0_i32_1 : i32, i32, i32, i32
  }
  func.func @transform_2(%arg0: i32, %arg1: i32) -> (i32, i32, i32, i32) {
    %c4_i32 = arith.constant 4 : i32
    %0 = arith.muli %arg1, %c4_i32 : i32
    %c4_i32_0 = arith.constant 4 : i32
    %1 = arith.addi %0, %c4_i32_0 : i32
    %c15_i32 = arith.constant 15 : i32
    %2 = arith.minsi %1, %c15_i32 : i32
    %c0_i32 = arith.constant 0 : i32
    %c0_i32_1 = arith.constant 0 : i32
    %c0_i32_2 = arith.constant 0 : i32
    return %arg0, %2, %c0_i32, %c0_i32_1 : i32, i32, i32, i32
  }
  func.func @transform_3(%arg0: i32, %arg1: i32) -> (i32, i32) {
    %c0_i32 = arith.constant 0 : i32
    %c0_i32_0 = arith.constant 0 : i32
    %c0_i32_1 = arith.constant 0 : i32
    return %c0_i32, %c0_i32_0 : i32, i32
  }
  func.func @transform_4(%arg0: i32, %arg1: i32) -> (i32, i32) {
    %c0_i32 = arith.constant 0 : i32
    %c0_i32_0 = arith.constant 0 : i32
    %c0_i32_1 = arith.constant 0 : i32
    return %c0_i32, %c0_i32_0 : i32, i32
  }
  func.func @transform_5(%arg0: i32, %arg1: i32) -> (i32, i32, i32) {
    %c0_i32 = arith.constant 0 : i32
    %c0_i32_0 = arith.constant 0 : i32
    %c0_i32_1 = arith.constant 0 : i32
    %c0_i32_2 = arith.constant 0 : i32
    return %c0_i32, %c0_i32_0, %c0_i32_1 : i32, i32, i32
  }
  func.func @transform_6(%arg0: i32, %arg1: i32) -> (i32, i32, i32, i32) {
    %c0_i32 = arith.constant 0 : i32
    %c0_i32_0 = arith.constant 0 : i32
    %c0_i32_1 = arith.constant 0 : i32
    return %arg0, %arg1, %c0_i32, %c0_i32_0 : i32, i32, i32, i32
  }
}

</mosaic_0001>

<bundles_post_ra>
// kernel: bottleneck_forward.2
= control target key start
LH: loop header
LB: loop body
LE: loop exit
PB: predicated region body
PF: predicated region fallthrough
CT: control target
= control target key end

     0   :  { %s1668_s0 = inlined_call_operand.hbm [shape: f32[2,16,16,4], index: 0, kind: input, shape index: {}]   ;;  %s1669_s1 = inlined_call_operand.hbm [shape: f32[1,4], index: 1, kind: input, shape index: {}]   ;;  %s1670_s2 = inlined_call_operand.hbm [shape: f32[1,4], index: 2, kind: input, shape index: {}]   ;;  %s1671_s3 = inlined_call_operand.hbm [shape: f32[4,32], index: 3, kind: input, shape index: {}]   ;;  %s1672_s4 = inlined_call_operand.hbm [shape: bf16[2,16,16,32], index: 4, kind: output, shape index: {0}]   ;;  %s1673_s5 = inlined_call_operand.hbm [shape: f32[2,4,2,32], index: 5, kind: output, shape index: {1}]  }
   0x1   :  { %1682 = sst [smem:[#allocation22_spill]] %s1669_s1 }
   0x2   :  { %1683 = sst [smem:[#allocation23_spill]] %s1670_s2 }
   0x3   :  { %1684 = sst [smem:[#allocation24_spill]] %s1671_s3 }
   0x4   :  { %11 = vsyncpa [#allocation3], 0 }
   0x5   :  { %13 = vsyncpa [#allocation3 + $0x1], 0 }
   0x6   :  { %14 = vsyncpa [#allocation6], 0 }
   0x7   :  { %15 = vsyncpa [#allocation9], 0 }
   0x8   :  { %16 = vsyncpa [#allocation4], 0 }
   0x9   :  { %18 = vsyncpa [#allocation4 + $0x1], 0 }
   0xa   :  { %19 = vsyncpa [#allocation12], 0 }
   0xb   :  { %21 = vsyncpa [#allocation12 + $0x1], 0  ;;  %s1276_s18 = smov 0   ;;  %s1278_s19 = smov 0  }
   0xc   :  { %s1280_s20 = smov 0   ;;  %s1282_s21 = smov 0  }
   0xd   :  { %s1284_s22 = smov 0   ;;  %s1286_s23 = smov 0  }
   0xe   :  { %s1288_s24 = smov 0   ;;  %s1290_s25 = smov 0  }
   0xf LB: > { %1685 = sst [smem:[#allocation18_spill]] %s1206_s18  ;;  %s781_s26 = sadd.s32 4294967295, %s1234_s25   ;;  %s1234_s25 = sphi %s1290_s25, %s27_s25   ;;  %s1230_s24 = sphi %s1288_s24, %s1717_s24   ;;  %s1226_s23 = sphi %s1286_s23, %s1716_s23   ;;  %s1222_s22 = sphi %s1284_s22, %s1715_s22   ;;  %s1218_s21 = sphi %s1282_s21, %s1714_s21   ;;  %s1214_s20 = sphi %s1280_s20, %s1713_s20   ;;  %s1210_s19 = sphi %s1278_s19, %s1712_s19   ;;  %s1206_s18 = sphi %s1276_s18, %s1711_s18  }
  0x10   : > { %s782_s27 = sadd.s32 4294967294, %s1234_s25   ;;  %p61_p0 = scmp.ne.s32.totalorder %s1210_s19, %s1206_s18 }
  0x11   : > { %p1320_p1 = scmp.eq.s32.totalorder %s781_s26, 0  ;;  %p1324_p2 = scmp.eq.s32.totalorder %s781_s26, 7 }
  0x12   : > { %p156_p3 = scmp.eq.s32.totalorder %s782_s27, 7  ;;  %p783_p5 = scmp.ge.s32.totalorder %s1234_s25, 1 }
  0x13   : > { %s1686_s28 = scalar_select %p1320_p1, 1, 0 }
  0x14   : > { %s1687_s29 = scalar_select %p1324_p2, 1, 0 }
  0x15   : > { %p1330_p4 = por %p1320_p1, %p61_p0  ;;  %p1335_p6 = por %p156_p3, %p61_p0 }
  0x16   : > { %p191_p7 = scmp.lt.s32.totalorder %s1234_s25, 9  ;;  %s1236_s8 = smov [#allocation5]  }
  0x17   : > { %s1688_s30 = scalar_select %p1330_p4, 1, 0 }
  0x18   : > { %s1689_s6 = scalar_select %p1335_p6, 1, 0 }
  0x19   : > { %p1340_p8 = pnand %p783_p5, %p191_p7  ;;  %s204_s9 = sshll.u32 %s1236_s8, 4  ;;  %s205_s9 = int_to_ptr.vmem [resolvable:$true] %s204_s9 }
  0x1a   : > { %1690 = sst [smem:[#allocation19_spill]] %s1689_s6  ;;  %s1237_s10 = smov [#allocation7]  }
  0x1b   : > { %s1691_s7 = scalar_select %p1340_p8, 1, 0 }
  0x1c   : > { %p882_p9 = pneg %p1340_p8  ;;  %s215_s11 = sshll.u32 %s1237_s10, 4  ;;  %s1352_s11 = int_to_ptr.vmem [resolvable:$true] %s215_s11 }
  0x1d   : > { %s1238_s13 = smov [#allocation8]   ;;  %s1693_s1 = sld [smem:[#allocation22_spill]] }
  0x1e   : > { %p1348_p10 = pnand %p882_p9, %p1320_p1  ;;  %s226_s14 = sshll.u32 %s1238_s13, 4  ;;  %s1354_s14 = int_to_ptr.vmem [resolvable:$true] %s226_s14 }
  0x20   : > { %p1364_p12 = pneg %p1348_p10 }
  0x23   : > { %s982_s17 = scalar_lea.hbm %s1693_s1, 16 }
  0x24   : > { %p983_p11 = scmp.ne.s32.totalorder %s1693_s1, %s982_s17  ;;  %p989_p3 = scmp.lt.u32.totalorder %s982_s17, %s1693_s1 }
  0x26   : > { %p985_p13 = pnand %p1364_p12, %p983_p11 }
  0x28   : > { %p986_p0 = pneg %p985_p13 }
  0x2a   : > { %p991_p5 = pnand %p989_p3, %p986_p0 }
  0x2c   : > { %994 = shalt.err (!%p991_p5)
}
  0x2d   : > { %s995_s15 = scalar_lea.vmem %s205_s9, 16  ;;  %s1002_s16 = scalar_lea.vmem %s205_s9, 32 }
  0x2e   : > { %p996_p7 = scmp.ne.s32.totalorder %s205_s9, %s995_s15  ;;  %p1003_p1 = scmp.lt.s32.totalorder %s205_s9, %s205_s9 }
  0x2f   : > { %p1004_p4 = scmp.lt.s32.totalorder %s1002_s16, %s995_s15 }
  0x30   : > { %p998_p9 = pnand %p996_p7, %p1364_p12 }
  0x31   : > { %p1005_p8 = por %p1004_p4, %p1003_p1 }
  0x32   : > { %p999_p6 = pneg %p998_p9 }
  0x34   : > { %p1006_p2 = pnand %p1005_p8, %p999_p6 }
  0x36   : > { %1009 = shalt.err (!%p1006_p2)
}
  0x37   : > { %885 = dma.hbm_to_vmem [thread:$0]  (!%p1348_p10), %s1693_s1, 16, %s205_s9, [#allocation6]  }
  0x38   : > { %s1695_s2 = sld [smem:[#allocation23_spill]] }
  0x3e   : > { %s1010_s13 = scalar_lea.hbm %s1695_s2, 16 }
  0x3f   : > { %p1011_p11 = scmp.ne.s32.totalorder %s1695_s2, %s1010_s13  ;;  %p1017_p2 = scmp.lt.u32.totalorder %s1010_s13, %s1695_s2 }
  0x41   : > { %p1013_p13 = pnand %p1011_p11, %p1364_p12 }
  0x43   : > { %p1014_p1 = pneg %p1013_p13 }
  0x45   : > { %p1019_p4 = pnand %p1017_p2, %p1014_p1 }
  0x47   : > { %1022 = shalt.err (!%p1019_p4)
}
  0x48   : > { %s1023_s9 = scalar_lea.vmem %s1352_s11, 16  ;;  %s1030_s18 = scalar_lea.vmem %s1352_s11, 32 }
  0x49   : > { %p1024_p6 = scmp.ne.s32.totalorder %s1352_s11, %s1023_s9  ;;  %p1031_p3 = scmp.lt.s32.totalorder %s1352_s11, %s1352_s11 }
  0x4a   : > { %p1032_p5 = scmp.lt.s32.totalorder %s1030_s18, %s1023_s9 }
  0x4b   : > { %p1026_p8 = pnand %p1024_p6, %p1364_p12 }
  0x4c   : > { %p1033_p7 = por %p1032_p5, %p1031_p3 }
  0x4d   : > { %p1027_p0 = pneg %p1026_p8 }
  0x4f   : > { %p1034_p9 = pnand %p1033_p7, %p1027_p0 }
  0x51   : > { %1037 = shalt.err (!%p1034_p9)
}
  0x52   : > { %888 = dma.hbm_to_vmem [thread:$0]  (!%p1348_p10), %s1695_s2, 16, %s1352_s11, [#allocation6]  }
  0x53   : > { %s1696_s3 = sld [smem:[#allocation24_spill]] }
  0x59   : > { %s1038_s10 = scalar_lea.hbm %s1696_s3, 64 }
  0x5a   : > { %p1039_p11 = scmp.ne.s32.totalorder %s1696_s3, %s1038_s10  ;;  %p1045_p2 = scmp.lt.u32.totalorder %s1038_s10, %s1696_s3 }
  0x5c   : > { %p1041_p13 = pnand %p1039_p11, %p1364_p12 }
  0x5e   : > { %p1042_p1 = pneg %p1041_p13 }
  0x60   : > { %p1047_p4 = pnand %p1045_p2, %p1042_p1 }
  0x62   : > { %1050 = shalt.err (!%p1047_p4)
}
  0x63   : > { %s1051_s11 = scalar_lea.vmem %s1354_s14, 64  ;;  %p1059_p3 = scmp.lt.s32.totalorder %s1354_s14, %s1354_s14 }
  0x64   : > { %p1052_p6 = scmp.ne.s32.totalorder %s1354_s14, %s1051_s11  ;;  %p1060_p5 = scmp.lt.s32.totalorder %s1051_s11, %s1051_s11 }
  0x66   : > { %p1054_p8 = pnand %p1052_p6, %p1364_p12  ;;  %p1061_p7 = por %p1060_p5, %p1059_p3 }
  0x68   : > { %p1055_p0 = pneg %p1054_p8 }
  0x6a   : > { %p1062_p9 = pnand %p1061_p7, %p1055_p0 }
  0x6c   : > { %1065 = shalt.err (!%p1062_p9)
}
  0x6d   : > { %891 = dma.hbm_to_vmem [thread:$0]  (!%p1348_p10), %s1696_s3, 64, %s1354_s14, [#allocation9]  }
  0x6e   : > { %s36_s8 = sadd.s32 1, %s1226_s23  ;;  %s39_s12 = sadd.s32 1, %s1230_s24 }
  0x6f   : > { %p37_p12 = scmp.ge.s32.totalorder %s36_s8, 4  ;;  %s48_s26 = sadd.s32 1, %s1214_s20 }
  0x70   : > { %p55_p11 = scmp.ne.s32.totalorder %s1214_s20, %s1210_s19  ;;  %p56_p13 = scmp.eq.s32.totalorder %s1234_s25, 0 }
  0x71   : > { %s1719_s8 = smov (%p37_p12, %s36_s8), 0  ;;  %s1721_s12 = smov (!%p37_p12, %s39_s12), %s1230_s24 }
  0x72   : > { %1697 = sst [smem:[#allocation20_spill]] %s1719_s8  ;;  %s44_s27 = ssub.s32 %s1226_s23, %s1719_s8 }
  0x73   : > { %p41_p1 = scmp.ge.s32.totalorder %s1721_s12, 2  ;;  %p1698_p2 = scmp.ne.s32.totalorder %s1687_s29, 0 }
  0x74   : > { %p1444_p10 = por %p56_p13, %p55_p11  ;;  %p906_p6 = scmp.lt.s32.totalorder %s1234_s25, 8 }
  0x75   : > { %p1440_p4 = por %p1698_p2, %p55_p11  ;;  %s1723_s12 = smov (%p41_p1, %s1721_s12), 0 }
  0x76   : > { %1701 = sst [smem:[#allocation21_spill]] %s1723_s12  ;;  %s237_s10 = sand.u32 1, %s1214_s20  }
  0x77   : > { %s829_s13 = sshll.u32 %s1226_s23, 3  ;;  %s43_s15 = ssub.s32 %s1230_s24, %s1723_s12 }
  0x78   : > { %s45_s16 = sor.u32 %s44_s27, %s43_s15  ;;  %s788_s9 = sshll.u32 %s237_s10, 6 }
  0x79   : > { %p46_p8 = scmp.eq.s32.totalorder %s45_s16, 0  ;;  %s791_s29 = sshll.u32 %s1230_s24, 5 }
  0x7a   : > { %s241_s11 = scalar_lea.vmem [#allocation2], %s788_s9  ;;  %s248_s1 = sadd.s32 %s829_s13, %s791_s29 }
  0x7b   : > { %s251_s18 = sshll.u32 %s241_s11, 4  ;;  %s792_s2 = sshll.u32 %s248_s1, 7  ;;  %s1459_s18 = int_to_ptr.vmem [resolvable:$true] %s251_s18 }
  0x7c   : > { %s1457_s6 = scalar_select %p46_p8, %s1214_s20, %s48_s26  }
  0x7d   : > { %p1465_p0 = pnand %p906_p6, %p1444_p10  ;;  %s1472_s27 = scalar_lea.hbm %s1668_s0, %s792_s2 }
  0x7e   : > { %s1474_s26 = scalar_lea.sflag [#allocation3], %s237_s10  ;;  %s1066_s1 = scalar_lea.hbm %s1472_s27, 1024 }
  0x7f   : > { %p1067_p3 = scmp.ne.s32.totalorder %s1472_s27, %s1066_s1  ;;  %p1068_p5 = pneg %p1465_p0 }
  0x80   : > { %s1071_s12 = scalar_lea.hbm %s1668_s0, 8192  ;;  %p1072_p12 = scmp.lt.u32.totalorder %s1472_s27, %s1668_s0 }
  0x81   : > { %p1069_p7 = pnand %p1068_p5, %p1067_p3  ;;  %p1073_p11 = scmp.lt.u32.totalorder %s1071_s12, %s1066_s1 }
  0x82   : > { %p1075_p1 = scmp.lt.u32.totalorder %s1066_s1, %s1472_s27 }
  0x83   : > { %p1070_p9 = pneg %p1069_p7  ;;  %p1074_p13 = por %p1073_p11, %p1072_p12 }
  0x85   : > { %p1076_p2 = por %p1075_p1, %p1074_p13 }
  0x87   : > { %p1077_p10 = pnand %p1076_p2, %p1070_p9 }
  0x89   : > { %1080 = shalt.err (!%p1077_p10)
}
  0x8a   : > { %s1081_s10 = scalar_lea.vmem %s1459_s18, 1024  ;;  %s1239_s15 = smov [#allocation2]  }
  0x8b   : > { %p1082_p6 = scmp.ne.s32.totalorder %s1459_s18, %s1081_s10  ;;  %s1086_s16 = sshll.u32 %s1239_s15, 4  ;;  %s1087_s16 = int_to_ptr.vmem [resolvable:$false] %s1086_s16 }
  0x8c   : > { %s1088_s9 = scalar_lea.vmem %s1087_s16, 2048  ;;  %p1089_p7 = scmp.lt.s32.totalorder %s1459_s18, %s1087_s16 }
  0x8d   : > { %p1084_p8 = pnand %p1082_p6, %p1068_p5  ;;  %p1090_p12 = scmp.lt.s32.totalorder %s1088_s9, %s1081_s10 }
  0x8f   : > { %p1085_p3 = pneg %p1084_p8  ;;  %p1091_p11 = por %p1090_p12, %p1089_p7 }
  0x91   : > { %p1092_p13 = pnand %p1091_p11, %p1085_p3 }
  0x93   : > { %1095 = shalt.err (!%p1092_p13)
}
  0x94   : > { %s1240_s29 = smov 128   ;;  %s1241_s11 = smov 8  }
  0x95   : > { %895 = dma.hbm_to_vmem [thread:$0]  (!%p1465_p0), %s1472_s27, 1024, %s1459_s18, %s1474_s26, %s1240_s29, %s1240_s29, %s1241_s11  }
  0x96   : > { %p1703_p5 = scmp.ne.s32.totalorder %s1691_s7, 0 }
  0x97   : > { %s1505_s1 = sand.u32 (!%p1703_p5), 1, %s1210_s19   ;;  %p1704_p9 = scmp.ne.s32.totalorder (!%p1703_p5), %s1688_s30, 0 }
  0x98   : > { %263 = sbr.rel (%p1703_p5) target bundleno = 444 (0x1bc), region = 36  ;;  %s794_s14 = sshll.u32 (!%p1703_p5), %s1505_s1, 6 }
  0x99   : > { %s266_s8 = scalar_lea.sflag (!%p1703_p5), [#allocation3], %s1505_s1  ;;  %s269_s12 = scalar_lea.vmem (!%p1703_p5), [#allocation2], %s794_s14 }
  0x9f   : > { %1185 = dma.done.wait (%p1704_p9), %s266_s8, 1024  }
  0xa0   : > { %1187 = vsyncadd (%p1704_p9), %s266_s8, 4294966272  ;;  %p1705_p1 = scmp.ne.s32.totalorder %s1686_s28, 0 }
  0xa2   : > { %1189 = dma.done.wait (%p1705_p1), [#allocation6], 32  }
  0xa3   : > { %1191 = vsyncadd (%p1705_p1), [#allocation6], 4294967264 }
  0xa4   : > { %1193 = dma.done.wait (%p1705_p1), [#allocation9], 64  }
  0xa5   : > { %1195 = vsyncadd (%p1705_p1), [#allocation9], 4294967232  ;;  %vm387_vm0 = vcmask 1043456   ;;  %v361_v0 = vld [vmem:[#allocation8] sm:$0xf]  ;;  %v316_v5 = vld [vmem:[%s269_s12 + $0x8] sm:$0xff] }
  0xa6   : > { %v315_v1 = vld [vmem:[%s269_s12] sm:$0xff]  ;;  %848 = vmatprep.subr.msk.mxu0 %vm387_vm0, %v361_v0  ;;  %v317_v6 = vld [vmem:[%s269_s12 + $0x10] sm:$0xff]  ;;  %862 = vmatprep.subr.msk.mxu1 %vm387_vm0, %v361_v0  ;;  %vm362_vm1 = vcmask 31744   ;;  %v318_v9 = vld [vmem:[%s269_s12 + $0x18] sm:$0xff]  ;;  %s798_s3 = sshll.u32 %s1505_s1, 5  ;;  %vm537_vm2 = vcmask 261120  }
  0xa7   : > { %v800_v2 = vld [vmem:[#allocation5] ss:$0 sm:$0xff]  ;;  %v801_v4 = vld [vmem:[#allocation7] ss:$0 sm:$0xff]  ;;  %849 = vmatpush3.msk.msra.mxu0 %vm387_vm0, %v361_v0  ;;  %863 = vmatpush3.msk.msra.mxu1 %vm387_vm0, %v361_v0  ;;  %v320_v11 = vld [vmem:[%s269_s12 + $0x28] sm:$0xff]  ;;  %s838_s28 = sshll.u32 %s1218_s21, 3 }
  0xa8   : > { %v330_v3 = vmul.f32 %v800_v2, %v315_v1  ;;  %v331_v7 = vmul.f32 %v800_v2, %v316_v5  ;;  %v332_v8 = vmul.f32 %v800_v2, %v317_v6  ;;  %v319_v10 = vld [vmem:[%s269_s12 + $0x20] sm:$0xff]  ;;  %v333_v13 = vmul.f32 %v800_v2, %v318_v9  ;;  %v321_v16 = vld [vmem:[%s269_s12 + $0x30] sm:$0xff]  ;;  %v322_v17 = vld [vmem:[%s269_s12 + $0x38] sm:$0xff]  ;;  %s823_s30 = sshll.u32 %s1222_s22, 5  ;;  %s1538_s18 = scalar_lea.vmem [#allocation10], %s798_s3 }
  0xa9   : > { %v334_v14 = vmul.f32 %v800_v2, %v319_v10  ;;  %v335_v15 = vmul.f32 %v800_v2, %v320_v11  ;;  %v336_v20 = vmul.f32 %v800_v2, %v321_v16  ;;  %v337_v21 = vmul.f32 %v800_v2, %v322_v17  ;;  %s1533_s7 = sadd.s32 %s838_s28, %s823_s30  ;;  %s613_s26 = sshll.u32 %s1538_s18, 4  ;;  %s1562_s26 = int_to_ptr.vmem [resolvable:$true] %s613_s26 }
  0xaa   : > { %v345_v12 = vadd.f32 %v801_v4, %v330_v3  ;;  %v346_v18 = vadd.f32 %v801_v4, %v331_v7  ;;  %v347_v19 = vadd.f32 %v801_v4, %v332_v8  ;;  %v348_v23 = vadd.f32 %v801_v4, %v333_v13  ;;  %s824_s27 = sshll.u32 %s1533_s7, 6  ;;  %s592_s15 = scalar_lea.sflag [#allocation4], %s1505_s1 }
  0xab   : > { %v349_v24 = vadd.f32 %v801_v4, %v334_v14  ;;  %v350_v25 = vadd.f32 %v801_v4, %v335_v15  ;;  %v351_v28 = vadd.f32 %v801_v4, %v336_v20  ;;  %v352_v29 = vadd.f32 %v801_v4, %v337_v21  ;;  %s1560_s10 = scalar_lea.hbm %s1672_s4, %s824_s27  ;;  %s1096_s16 = scalar_lea.vmem %s1562_s26, 512 }
  0xac   : > { %v353_v22 = vmax.f32 %v345_v12, 0.0  ;;  %v354_v26 = vmax.f32 %v346_v18, 0.0  ;;  %v355_v27 = vmax.f32 %v347_v19, 0.0  ;;  %v356_v32 = vmax.f32 %v348_v23, 0.0  ;;  %p1097_p0 = scmp.ne.s32.totalorder %s1562_s26, %s1096_s16  ;;  %s1242_s9 = smov [#allocation10]  }
  0xad   : > { %v357_v30 = vmax.f32 %v349_v24, 0.0  ;;  %v358_v31 = vmax.f32 %v350_v25, 0.0  ;;  %v359_v33 = vmax.f32 %v351_v28, 0.0  ;;  %v360_v34 = vmax.f32 %v352_v29, 0.0  ;;  %s1100_s29 = sshll.u32 %s1242_s9, 4  ;;  %s1101_s29 = int_to_ptr.vmem [resolvable:$false] %s1100_s29 }
  0xae   : > { %850 = vmatprep.mubr.msk.f32.mxu0 %vm362_vm1, %v353_v22  ;;  %vm528_vm3 = vcmask 257024   ;;  %p1098_p2 = pnand %p1097_p0, %p1440_p4  ;;  %s1102_s11 = scalar_lea.vmem %s1101_s29, 1024 }
  0xaf   : > { %851 = vmatmul.mubr.msk.f32.vlgmr.msra.gmra.mrb[0].mxu0 %vm362_vm1, %v354_v26  ;;  %856 = vmatprep.mubr.msk.f32.mxu1 %vm362_vm1, %v357_v30  ;;  %p1103_p6 = scmp.lt.s32.totalorder %s1562_s26, %s1101_s29  ;;  %p1104_p8 = scmp.lt.s32.totalorder %s1102_s11, %s1096_s16 }
  0xb0   : > { %853 = vmatprep.mubr.msk.f32.mxu0 %vm362_vm1, %v355_v27  ;;  %857 = vmatmul.mubr.msk.f32.vlgmr.msra.gmra.mrb[0].mxu1 %vm362_vm1, %v358_v31  ;;  %p1099_p10 = pneg %p1098_p2 }
  0xb1   : > { %859 = vmatprep.mubr.msk.f32.mxu1 %vm362_vm1, %v359_v33  ;;  %p1105_p3 = por %p1104_p8, %p1103_p6 }
  0xb3   : > { %854 = vmatmul.mubr.msk.f32.gmra.mrb[2].mxu0 %vm362_vm1, %v356_v32  ;;  %p1106_p7 = pnand %p1105_p3, %p1099_p10 }
  0xb4   : > { %860 = vmatmul.mubr.msk.f32.gmra.mrb[2].mxu1 %vm362_vm1, %v360_v34 }
 0x182   : > { %v852_v35 = vpop.f32.mrb[0].mxu0 }
 0x183   : > { %v831_v36 = vpack.c.bf16 %v852_v35, %v852_v35  ;;  %v539_v37 = vsel %vm537_vm2, %v852_v35, 0.0  ;;  %v562_v38 = vmul.f32 %v852_v35, %v852_v35  ;;  %v457_v39 = vpop.f32.mrb[1].mxu0  ;;  %v1536_v43 = vpop.f32.mrb[0].mxu1 }
 0x184   : > { %v830_v40 = vpack.c.bf16 %v457_v39, %v457_v39  ;;  %v538_v41 = vsel %vm537_vm2, %v457_v39, 0.0  ;;  %v561_v42 = vmul.f32 %v457_v39, %v457_v39  ;;  %v835_v46 = vpack.c.bf16 %v1536_v43, %v1536_v43  ;;  %v477_v47 = vpop.f32.mrb[1].mxu1 }
 0x185   : > { %530 = vst.msk [vmem:[%s1538_s18 + $0x4] sm:$0xf] %vm528_vm3, %v831_v36  ;;  %v570_v44 = vsel %vm537_vm2, %v562_v38, 0.0  ;;  %v540_v45 = vadd.f32 %v539_v37, %v538_v41  ;;  %v834_v50 = vpack.c.bf16 %v477_v47, %v477_v47  ;;  %v565_v60 = vmul.f32 %v477_v47, %v477_v47 }
 0x186   : > { %529 = vst.msk [vmem:[%s1538_s18] sm:$0xf] %vm528_vm3, %v830_v40  ;;  %v569_v48 = vsel %vm537_vm2, %v561_v42, 0.0  ;;  %v855_v49 = vpop.f32.mrb[2].mxu0  ;;  %534 = vst.msk [vmem:[%s1538_s18 + $0x14] sm:$0xf] %vm528_vm3, %v835_v46  ;;  %v566_v6 = vmul.f32 %v1536_v43, %v1536_v43 }
 0x187   : > { %v571_v51 = vadd.f32 %v570_v44, %v569_v48  ;;  %v833_v52 = vpack.c.bf16 %v855_v49, %v855_v49  ;;  %v467_v53 = vpop.f32.mrb[3].mxu0  ;;  %v564_v54 = vmul.f32 %v855_v49, %v855_v49  ;;  %533 = vst.msk [vmem:[%s1538_s18 + $0x10] sm:$0xf] %vm528_vm3, %v834_v50  ;;  %v861_v58 = vpop.f32.mrb[2].mxu1  ;;  %v543_v63 = vsel %vm537_vm2, %v855_v49, 0.0 }
 0x188   : > { %v832_v55 = vpack.c.bf16 %v467_v53, %v467_v53  ;;  %v541_v56 = vsel %vm537_vm2, %v467_v53, 0.0  ;;  %v563_v57 = vmul.f32 %v467_v53, %v467_v53  ;;  %v837_v61 = vpack.c.bf16 %v861_v58, %v861_v58  ;;  %v487_v62 = vpop.f32.mrb[3].mxu1 }
 0x189   : > { %532 = vst.msk [vmem:[%s1538_s18 + $0xc] sm:$0xf] %vm528_vm3, %v833_v52  ;;  %v542_v59 = vadd.f32 %v541_v56, %v540_v45  ;;  %v545_v1 = vsel %vm537_vm2, %v477_v47, 0.0  ;;  %v836_v2 = vpack.c.bf16 %v487_v62, %v487_v62  ;;  %v574_v5 = vsel %vm537_vm2, %v564_v54, 0.0 }
 0x18a   : > { %531 = vst.msk [vmem:[%s1538_s18 + $0x8] sm:$0xf] %vm528_vm3, %v832_v55  ;;  %v572_v0 = vsel %vm537_vm2, %v563_v57, 0.0  ;;  %536 = vst.msk [vmem:[%s1538_s18 + $0x1c] sm:$0xf] %vm528_vm3, %v837_v61  ;;  %v576_v7 = vsel %vm537_vm2, %v565_v60, 0.0  ;;  %v567_v8 = vmul.f32 %v487_v62, %v487_v62 }
 0x18b   : > { %v544_v3 = vadd.f32 %v543_v63, %v542_v59  ;;  %v573_v4 = vadd.f32 %v572_v0, %v571_v51  ;;  %535 = vst.msk [vmem:[%s1538_s18 + $0x18] sm:$0xf] %vm528_vm3, %v836_v2 }
 0x18d   : > { %v575_v9 = vadd.f32 %v574_v5, %v573_v4  ;;  %v546_v10 = vadd.f32 %v545_v1, %v544_v3 }
 0x18e   : > { %1109 = shalt.err (!%p1106_p7)
}
 0x18f   : > { %s1110_s14 = scalar_lea.hbm %s1560_s10, 512  ;;  %s1114_s3 = scalar_lea.hbm %s1672_s4, 4096 }
 0x190   : > { %p1111_p12 = scmp.ne.s32.totalorder %s1560_s10, %s1110_s14  ;;  %p1115_p5 = scmp.lt.u32.totalorder %s1560_s10, %s1672_s4 }
 0x191   : > { %p1116_p9 = scmp.lt.u32.totalorder %s1114_s3, %s1110_s14  ;;  %p1118_p0 = scmp.lt.u32.totalorder %s1110_s14, %s1560_s10 }
 0x192   : > { %p1112_p11 = pnand %p1111_p12, %p1440_p4 }
 0x193   : > { %p1117_p1 = por %p1116_p9, %p1115_p5 }
 0x194   : > { %p1113_p13 = pneg %p1112_p11 }
 0x195   : > { %p1119_p2 = por %p1118_p0, %p1117_p1 }
 0x197   : > { %p1120_p10 = pnand %p1119_p2, %p1113_p13 }
 0x199   : > { %1123 = shalt.err (!%p1120_p10)
}
 0x19a   : > { %s1243_s7 = smov 64   ;;  %s1244_s18 = smov 4   ;;  %v547_v11 = vsel %vm537_vm2, %v1536_v43, 0.0  ;;  %v549_v12 = vsel %vm537_vm2, %v487_v62, 0.0  ;;  %v577_v13 = vadd.f32 %v576_v7, %v575_v9  ;;  %v578_v15 = vsel %vm537_vm2, %v566_v6, 0.0 }
 0x19b   : > { %878 = dma.vmem_to_hbm [thread:$0]  (%p1440_p4), %s1562_s26, 512, %s1560_s10, %s592_s15, %s1243_s7, %s1243_s7, %s1244_s18   ;;  %v548_v14 = vadd.f32 %v547_v11, %v546_v10  ;;  %v568_v16 = vmul.f32 %v861_v58, %v861_v58  ;;  %v580_v17 = vsel %vm537_vm2, %v567_v8, 0.0  ;;  %v551_v20 = vsel %vm537_vm2, %v861_v58, 0.0 }
 0x19c   : > { %v579_v19 = vadd.f32 %v578_v15, %v577_v13  ;;  %s799_s27 = sshll.u32 %s1505_s1, 1  ;;  %s825_s26 = sshll.u32 %s1222_s22, 2  ;;  %vm559_vm4 = vcmask 253952  }
 0x19d   : > { %v550_v18 = vadd.f32 %v549_v12, %v548_v14  ;;  %v582_v23 = vsel %vm537_vm2, %v568_v16, 0.0  ;;  %s627_s2 = sadd.s32 %s1218_s21, %s825_s26  ;;  %s312_s10 = scalar_lea.vmem [#allocation11], %s799_s27 }
 0x19e   : > { %v581_v22 = vadd.f32 %v580_v17, %v579_v19  ;;  %s826_s13 = sshll.u32 %s627_s2, 5  ;;  %s631_s15 = sshll.u32 %s312_s10, 4  ;;  %s1616_s15 = int_to_ptr.vmem [resolvable:$true] %s631_s15 }
 0x19f   : > { %v552_v21 = vadd.f32 %v551_v20, %v550_v18  ;;  %s1614_s22 = scalar_lea.hbm %s1673_s5, %s826_s13  ;;  %s597_s21 = scalar_lea.sflag [#allocation12], %s1505_s1 }
 0x1a0   : > { %v583_v25 = vadd.f32 %v582_v23, %v581_v22  ;;  %s1124_s29 = scalar_lea.vmem %s1616_s15, 32  ;;  %s1245_s11 = smov [#allocation11]  }
 0x1a1   : > { %v553_v24 = vrot.slane %v552_v21, 4  ;;  %p1125_p6 = scmp.ne.s32.totalorder %s1616_s15, %s1124_s29  ;;  %s1128_s14 = sshll.u32 %s1245_s11, 4  ;;  %s1129_s14 = int_to_ptr.vmem [resolvable:$false] %s1128_s14 }
 0x1a2   : > { %v584_v27 = vrot.slane %v583_v25, 4  ;;  %s1130_s8 = scalar_lea.vmem %s1129_s14, 64  ;;  %p1131_p7 = scmp.lt.s32.totalorder %s1616_s15, %s1129_s14 }
 0x1a3   : > { %v554_v26 = vadd.f32 %v553_v24, %v552_v21  ;;  %p1126_p8 = pnand %p1125_p6, %p1440_p4  ;;  %p1132_p12 = scmp.lt.s32.totalorder %s1130_s8, %s1124_s29 }
 0x1a4   : > { %v585_v29 = vadd.f32 %v584_v27, %v583_v25 }
 0x1a5   : > { %v555_v28 = vrot.slane %v554_v26, 2  ;;  %p1127_p3 = pneg %p1126_p8  ;;  %p1133_p11 = por %p1132_p12, %p1131_p7 }
 0x1a6   : > { %v586_v31 = vrot.slane %v585_v29, 2 }
 0x1a7   : > { %v556_v30 = vadd.f32 %v555_v28, %v554_v26  ;;  %p1134_p13 = pnand %p1133_p11, %p1127_p3 }
 0x1a8   : > { %v587_v33 = vadd.f32 %v586_v31, %v585_v29 }
 0x1a9   : > { %v557_v32 = vrot.slane %v556_v30, 1 }
 0x1aa   : > { %v588_v35 = vrot.slane %v587_v33, 1 }
 0x1ab   : > { %v558_v34 = vadd.f32 %v557_v32, %v556_v30 }
 0x1ac   : > { %v589_v36 = vadd.f32 %v588_v35, %v587_v33 }
 0x1ad   : > { %560 = vst.msk [vmem:[%s312_s10] sm:$0x1] %vm559_vm4, %v558_v34 }
 0x1ae   : > { %590 = vst.msk [vmem:[%s312_s10 + $0x1] sm:$0x1] %vm559_vm4, %v589_v36 }
 0x1af   : > { %1137 = shalt.err (!%p1134_p13)
}
 0x1b0   : > { %s1138_s1 = scalar_lea.hbm %s1614_s22, 32  ;;  %s1142_s28 = scalar_lea.hbm %s1673_s5, 256 }
 0x1b1   : > { %p1139_p5 = scmp.ne.s32.totalorder %s1614_s22, %s1138_s1  ;;  %p1143_p0 = scmp.lt.u32.totalorder %s1614_s22, %s1673_s5 }
 0x1b2   : > { %p1144_p2 = scmp.lt.u32.totalorder %s1142_s28, %s1138_s1  ;;  %p1146_p6 = scmp.lt.u32.totalorder %s1138_s1, %s1614_s22 }
 0x1b3   : > { %p1140_p9 = pnand %p1139_p5, %p1440_p4 }
 0x1b4   : > { %p1145_p10 = por %p1144_p2, %p1143_p0 }
 0x1b5   : > { %p1141_p1 = pneg %p1140_p9 }
 0x1b6   : > { %p1147_p8 = por %p1146_p6, %p1145_p10 }
 0x1b8   : > { %p1148_p3 = pnand %p1147_p8, %p1141_p1 }
 0x1ba   : > { %1151 = shalt.err (!%p1148_p3)
}
 0x1bb   : > { %879 = dma.vmem_to_hbm [thread:$0]  (%p1440_p4), %s1616_s15, 32, %s1614_s22, %s597_s21  }
 0x1bc PF: > { %s1706_s18 = sld [smem:[#allocation18_spill]]  ;;  %s1707_s27 = sld [smem:[#allocation19_spill]] }
 0x1bd   : > { %p910_p7 = scmp.ge.s32.totalorder %s1234_s25, 2 }
 0x1c2   : > { %s643_s26 = sand.u32 1, %s1706_s18   ;;  %p1708_p12 = scmp.ne.s32.totalorder %s1707_s27, 0 }
 0x1c3   : > { %s644_s2 = scalar_lea.sflag [#allocation4], %s643_s26 }
 0x1c4   : > { %p897_p11 = pnand %p910_p7, %p1708_p12 }
 0x1c6   : > { %1197 = dma.done.wait (!%p897_p11), %s644_s2, 512  }
 0x1c7   : > { %1199 = vsyncadd (!%p897_p11), %s644_s2, 4294966784  ;;  %s653_s13 = scalar_lea.sflag [#allocation12], %s643_s26 }
 0x1c8   : > { %1201 = dma.done.wait (!%p897_p11), %s653_s13, 32  }
 0x1c9   : > { %1203 = vsyncadd (!%p897_p11), %s653_s13, 4294967264  ;;  %s27_s25 = sadd.s32 1, %s1234_s25   ;;  %s1709_s17 = sld [smem:[#allocation20_spill]] }
 0x1ca   : > { %p24_p13 = scmp.ge.s32.totalorder %s27_s25, 10   ;;  %s1710_s10 = sld [smem:[#allocation21_spill]] }
 0x1cb   : > { %s1711_s18 = smov %s1210_s19  ;;  %s1712_s19 = smov %s1214_s20 }
 0x1cc   : > { %s1713_s20 = smov %s1457_s6  ;;  %s1714_s21 = smov %s1226_s23 }
 0x1cd   : > { %s1715_s22 = smov %s1230_s24  ;;  %26 = sbr.rel (!%p24_p13) target bundleno = 15 (0xf), region = 110 }
 0x1cf   : > { %s1716_s23 = smov %s1709_s17 }
 0x1d0   : > { %s1717_s24 = smov %s1710_s10 }
 0x1d4   :  { %658 = vsyncpa [#allocation3], 1 }
 0x1d5   :  { %660 = vsyncpa [#allocation3 + $0x1], 1 }
 0x1d6   :  { %661 = vsyncpa [#allocation6], 1 }
 0x1d7   :  { %662 = vsyncpa [#allocation9], 1 }
 0x1d8   :  { %663 = vsyncpa [#allocation4], 1 }
 0x1d9   :  { %665 = vsyncpa [#allocation4 + $0x1], 1 }
 0x1da   :  { %666 = vsyncpa [#allocation12], 1 }
 0x1db   :  { %668 = vsyncpa [#allocation12 + $0x1], 1 }

// kernel: bottleneck_forward.3
= control target key start
LH: loop header
LB: loop body
LE: loop exit
PB: predicated region body
PF: predicated region fallthrough
CT: control target
= control target key end

     0   :  { %s3914_s0 = inlined_call_operand.hbm [shape: bf16[2,16,16,32], index: 0, kind: input, shape index: {}, may-alias: {0,1,2}]   ;;  %s3915_s1 = inlined_call_operand.hbm [shape: bf16[2,16,16,32], index: 1, kind: input, shape index: {}, may-alias: {0,1,2}]   ;;  %s3916_s2 = inlined_call_operand.hbm [shape: bf16[2,16,16,32], index: 2, kind: input, shape index: {}, may-alias: {0,1,2}]   ;;  %s3917_s3 = inlined_call_operand.hbm [shape: f32[1,32], index: 3, kind: input, shape index: {}]   ;;  %s3918_s4 = inlined_call_operand.hbm [shape: f32[1,32], index: 4, kind: input, shape index: {}]   ;;  %s3919_s5 = inlined_call_operand.hbm [shape: f32[9,32,128], index: 5, kind: input, shape index: {}]   ;;  %s3920_s6 = inlined_call_operand.hbm [shape: f32[2,16,16,8], index: 6, kind: output, shape index: {}]  }
   0x1   :  { %3952 = sst [smem:[#allocation35_spill]] %s3914_s0 }
   0x2   :  { %3953 = sst [smem:[#allocation36_spill]] %s3915_s1 }
   0x3   :  { %3954 = sst [smem:[#allocation37_spill]] %s3916_s2 }
   0x4   :  { %3955 = sst [smem:[#allocation38_spill]] %s3917_s3 }
   0x5   :  { %3956 = sst [smem:[#allocation39_spill]] %s3918_s4 }
   0x6   :  { %3957 = sst [smem:[#allocation40_spill]] %s3919_s5 }
   0x7   :  { %3958 = sst [smem:[#allocation41_spill]] %s3920_s6 }
   0x8   :  { %11 = vsyncpa [#allocation3], 0 }
   0x9   :  { %13 = vsyncpa [#allocation3 + $0x1], 0 }
   0xa   :  { %14 = vsyncpa [#allocation6], 0 }
   0xb   :  { %16 = vsyncpa [#allocation6 + $0x1], 0 }
   0xc   :  { %17 = vsyncpa [#allocation9], 0 }
   0xd   :  { %18 = vsyncpa [#allocation12], 0 }
   0xe   :  { %19 = vsyncpa [#allocation4], 0 }
   0xf   :  { %21 = vsyncpa [#allocation4 + $0x1], 0  ;;  %s3078_s21 = smov 0   ;;  %s3080_s22 = smov 0  }
  0x10   :  { %s3082_s23 = smov 0   ;;  %s3084_s24 = smov 0  }
  0x11   :  { %s3086_s25 = smov 0   ;;  %s3088_s26 = smov 0  }
  0x12   :  { %s3090_s27 = smov 0   ;;  %s3092_s28 = smov 0  }
  0x13   :  { %s3094_s29 = smov 0   ;;  %s3096_s30 = smov 0  }
  0x14   :  { %s3098_s7 = smov 0   ;;  %s3100_s8 = smov 0  }
  0x15   :  { %s3102_s9 = smov 0   ;;  %s3104_s10 = smov 0  }
  0x16 LB: > { %3959 = sst [smem:[#allocation20_spill]] %s2976_s21  ;;  %s3149_s11 = sadd.s32 4294967295, %s3028_s10   ;;  %s3028_s10 = sphi %s3104_s10, %s27_s10   ;;  %s3024_s9 = sphi %s3102_s9, %s4040_s9   ;;  %s3020_s8 = sphi %s3100_s8, %s4039_s8   ;;  %s3016_s7 = sphi %s3098_s7, %s4048_s7   ;;  %s3012_s30 = sphi %s3096_s30, %s4037_s30   ;;  %s3008_s29 = sphi %s3094_s29, %s4047_s29   ;;  %s3004_s28 = sphi %s3092_s28, %s4046_s28   ;;  %s3000_s27 = sphi %s3090_s27, %s4045_s27   ;;  %s2996_s26 = sphi %s3088_s26, %s4044_s26   ;;  %s2992_s25 = sphi %s3086_s25, %s4043_s25   ;;  %s2988_s24 = sphi %s3084_s24, %s4042_s24   ;;  %s2984_s23 = sphi %s3082_s23, %s4041_s23   ;;  %s2980_s22 = sphi %s3080_s22, %s4033_s22   ;;  %s2976_s21 = sphi %s3078_s21, %s4032_s21  }
  0x17   : > { %3960 = sst [smem:[#allocation21_spill]] %s2980_s22  ;;  %p1952_p0 = scmp.ge.s32.totalorder %s3028_s10, 1 }
  0x18   : > { %3961 = sst [smem:[#allocation22_spill]] %s2984_s23  ;;  %p3922_p1 = scmp.eq.s32.totalorder %s3149_s11, 0 }
  0x19   : > { %3962 = sst [smem:[#allocation23_spill]] %s2992_s25  ;;  %p235_p3 = scmp.lt.s32.totalorder %s3028_s10, 9 }
  0x1a   : > { %3963 = sst [smem:[#allocation24_spill]] %s3012_s30  ;;  %s3030_s13 = smov [#allocation8]  }
  0x1b   : > { %3964 = sst [smem:[#allocation25_spill]] %s3016_s7  ;;  %p3155_p4 = pnand %p1952_p0, %p235_p3 }
  0x1c   : > { %3965 = sst [smem:[#allocation26_spill]] %s3020_s8  ;;  %s248_s14 = sshll.u32 %s3030_s13, 4  ;;  %s249_s14 = int_to_ptr.vmem [resolvable:$true] %s248_s14 }
  0x1d   : > { %3966 = sst [smem:[#allocation27_spill]] %s3024_s9  ;;  %p2539_p5 = pneg %p3155_p4 }
  0x1e   : > { %s3967_s12 = scalar_select %p3155_p4, 1, 0 }
  0x1f   : > { %p3163_p6 = pnand %p2539_p5, %p3922_p1  ;;  %s3970_s3 = sld [smem:[#allocation38_spill]] }
  0x20   : > { %3968 = sst [smem:[#allocation28_spill]] %s3967_s12 }
  0x21   : > { %s3969_s15 = scalar_select %p3163_p6, 1, 0 }
  0x22   : > { %p3175_p8 = pneg %p3163_p6 }
  0x25   : > { %s2692_s18 = scalar_lea.hbm %s3970_s3, 16 }
  0x26   : > { %p2693_p7 = scmp.ne.s32.totalorder %s3970_s3, %s2692_s18  ;;  %p2699_p11 = scmp.lt.u32.totalorder %s2692_s18, %s3970_s3 }
  0x28   : > { %p2695_p9 = pnand %p3175_p8, %p2693_p7 }
  0x2a   : > { %p2696_p10 = pneg %p2695_p9 }
  0x2c   : > { %p2701_p12 = pnand %p2699_p11, %p2696_p10 }
  0x2e   : > { %2704 = shalt.err (!%p2701_p12)
}
  0x2f   : > { %s2705_s16 = scalar_lea.vmem %s249_s14, 16  ;;  %s2712_s17 = scalar_lea.vmem %s249_s14, 32 }
  0x30   : > { %p2706_p13 = scmp.ne.s32.totalorder %s249_s14, %s2705_s16  ;;  %p2713_p5 = scmp.lt.s32.totalorder %s249_s14, %s249_s14 }
  0x31   : > { %p2714_p2 = scmp.lt.s32.totalorder %s2712_s17, %s2705_s16 }
  0x32   : > { %p2708_p0 = pnand %p2706_p13, %p3175_p8 }
  0x33   : > { %p2715_p1 = por %p2714_p2, %p2713_p5 }
  0x34   : > { %p2709_p3 = pneg %p2708_p0 }
  0x36   : > { %p2716_p4 = pnand %p2715_p1, %p2709_p3 }
  0x38   : > { %2719 = shalt.err (!%p2716_p4)
}
  0x39   : > { %2542 = dma.hbm_to_vmem [thread:$0]  (!%p3163_p6), %s3970_s3, 16, %s249_s14, [#allocation9]  }
  0x3a   : > { %s36_s6 = sadd.s32 1, %s3020_s8  ;;  %s39_s7 = sadd.s32 1, %s3024_s9 }
  0x3b   : > { %p37_p1 = scmp.ge.s32.totalorder %s36_s6, 4  ;;  %p3939_p2 = scmp.eq.s32.totalorder %s3028_s10, 0 }
  0x3c   : > { %s1946_s18 = sshll.u32 %s3020_s8, 2  ;;  %s84_s16 = sadd.s32 1, %s2996_s26 }
  0x3d   : > { %s4050_s6 = smov (%p37_p1, %s36_s6), 0  ;;  %s4052_s7 = smov (!%p37_p1, %s39_s7), %s3024_s9 }
  0x3e   : > { %3972 = sst [smem:[#allocation29_spill]] %s4050_s6  ;;  %s44_s17 = ssub.s32 %s3020_s8, %s4050_s6 }
  0x3f   : > { %s1947_s19 = sadd.s32 4294967295, %s1946_s18  ;;  %p41_p4 = scmp.ge.s32.totalorder %s4052_s7, 2 }
  0x40   : > { %p73_p7 = scmp.gt.s32.totalorder %s1947_s19, 0  ;;  %s1948_s14 = sshll.u32 %s4050_s6, 2 }
  0x41   : > { %p91_p9 = scmp.ne.s32.totalorder %s2996_s26, %s2992_s25  ;;  %s4054_s7 = smov (%p41_p4, %s4052_s7), 0 }
  0x42   : > { %3973 = sst [smem:[#allocation30_spill]] %s4054_s7  ;;  %s4056_s19 = smov (!%p73_p7, %s1947_s19), 0 }
  0x43   : > { %s3208_s20 = ssub.s32 %s3024_s9, %s4054_s7  ;;  %s1949_s3 = sadd.s32 4294967295, %s1948_s14 }
  0x44   : > { %3974 = sst [smem:[#allocation31_spill]] %s3208_s20  ;;  %s3211_s30 = sor.u32 %s44_s17, %s3208_s20 }
  0x45   : > { %p77_p10 = scmp.gt.s32.totalorder %s1949_s3, 0  ;;  %p3216_p12 = por %p91_p9, %p3939_p2 }
  0x46   : > { %p97_p13 = scmp.ne.s32.totalorder %s2992_s25, %s2988_s24  ;;  %s3222_s7 = sadd.s32 4, %s1946_s18 }
  0x47   : > { %s4058_s3 = smov (!%p77_p10, %s1949_s3), 0  ;;  %3976 = sst [smem:[#allocation32_spill]] %s3222_s7 }
  0x48   : > { %s80_s12 = ssub.s32 %s4056_s19, %s4058_s3  ;;  %p3977_p3 = scmp.eq.s32.totalorder %s3149_s11, 0 }
  0x49   : > { %s81_s17 = sor.u32 %s80_s12, %s3208_s20  ;;  %s3232_s21 = sadd.s32 4, %s1948_s14 }
  0x4a   : > { %p3228_p5 = por %p97_p13, %p3977_p3  ;;  %p82_p1 = scmp.eq.s32.totalorder %s81_s17, 0 }
  0x4b   : > { %p3938_p7 = scmp.lt.s32.totalorder %s3028_s10, 8  ;;  %s3240_s18 = sshll.u32 %s3024_s9, 5 }
  0x4c   : > { %s3978_s2 = scalar_select %p3228_p5, 1, 0 }
  0x4d   : > { %s3237_s24 = scalar_select %p82_p1, %s2996_s26, %s84_s16  }
  0x4e   : > { %3979 = sst [smem:[#allocation33_spill]] %s3978_s2  ;;  %s307_s3 = sand.u32 1, %s3028_s10  }
  0x4f   : > { %s309_s12 = sand.u32 1, %s2996_s26   ;;  %s1965_s20 = sshll.u32 %s4056_s19, 1 }
  0x50   : > { %s1962_s25 = sshll.u32 %s309_s12, 3  ;;  %s321_s22 = sadd.s32 %s1965_s20, %s3240_s18 }
  0x51   : > { %s1967_s7 = sshll.u32 %s321_s22, 6  ;;  %s311_s2 = scalar_lea.vmem [#allocation5], %s1962_s25 }
  0x52   : > { %s324_s17 = sshll.u32 %s311_s2, 4  ;;  %s3980_s1 = sld [smem:[#allocation36_spill]]  ;;  %s3250_s17 = int_to_ptr.vmem [resolvable:$true] %s324_s17 }
  0x53   : > { %p3256_p9 = pnand %p3938_p7, %p3216_p12  ;;  %s3031_s2 = smov [#allocation10]  }
  0x54   : > { %s259_s22 = sshll.u32 %s3031_s2, 4  ;;  %s3262_s0 = scalar_lea.sflag [#allocation6], %s307_s3  ;;  %s3260_s22 = int_to_ptr.vmem [resolvable:$true] %s259_s22 }
  0x55   : > { %p2722_p13 = pneg %p3256_p9 }
  0x58   : > { %s3248_s14 = scalar_lea.hbm %s3980_s1, %s1967_s7  ;;  %s2725_s7 = scalar_lea.hbm %s3980_s1, 4096 }
  0x59   : > { %s2720_s23 = scalar_lea.hbm %s3248_s14, 128  ;;  %p2726_p12 = scmp.lt.u32.totalorder %s3248_s14, %s3980_s1 }
  0x5a   : > { %p2721_p10 = scmp.ne.s32.totalorder %s3248_s14, %s2720_s23  ;;  %p2727_p4 = scmp.lt.u32.totalorder %s2725_s7, %s2720_s23 }
  0x5b   : > { %p2729_p7 = scmp.lt.u32.totalorder %s2720_s23, %s3248_s14 }
  0x5c   : > { %p2723_p3 = pnand %p2722_p13, %p2721_p10  ;;  %p2728_p0 = por %p2727_p4, %p2726_p12 }
  0x5e   : > { %p2724_p1 = pneg %p2723_p3  ;;  %p2730_p2 = por %p2729_p7, %p2728_p0 }
  0x60   : > { %p2731_p11 = pnand %p2730_p2, %p2724_p1 }
  0x62   : > { %2734 = shalt.err (!%p2731_p11)
}
  0x63   : > { %s2735_s3 = scalar_lea.vmem %s3250_s17, 128  ;;  %s3032_s12 = smov [#allocation5]  }
  0x64   : > { %p2736_p10 = scmp.ne.s32.totalorder %s3250_s17, %s2735_s3  ;;  %s2740_s2 = sshll.u32 %s3032_s12, 4  ;;  %s2741_s2 = int_to_ptr.vmem [resolvable:$false] %s2740_s2 }
  0x65   : > { %s2742_s25 = scalar_lea.vmem %s2741_s2, 256  ;;  %p2743_p6 = scmp.lt.s32.totalorder %s3250_s17, %s2741_s2 }
  0x66   : > { %p2738_p3 = pnand %p2736_p10, %p2722_p13  ;;  %p2744_p4 = scmp.lt.s32.totalorder %s2742_s25, %s2735_s3 }
  0x68   : > { %p2739_p5 = pneg %p2738_p3  ;;  %p2745_p12 = por %p2744_p4, %p2743_p6 }
  0x6a   : > { %p2746_p0 = pnand %p2745_p12, %p2739_p5 }
  0x6c   : > { %2749 = shalt.err (!%p2746_p0)
}
  0x6d   : > { %s3943_s23 = smov 64   ;;  %s3945_s6 = smov 4  }
  0x6e   : > { %2555 = dma.hbm_to_vmem [thread:$0]  (!%p3256_p9), %s3248_s14, 128, %s3250_s17, %s3262_s0, %s3943_s23, %s3943_s23, %s3945_s6  }
  0x6f   : > { %s3982_s4 = sld [smem:[#allocation39_spill]] }
  0x75   : > { %s2750_s20 = scalar_lea.hbm %s3982_s4, 16 }
  0x76   : > { %p2751_p6 = scmp.ne.s32.totalorder %s3982_s4, %s2750_s20  ;;  %p2757_p5 = scmp.lt.u32.totalorder %s2750_s20, %s3982_s4 }
  0x78   : > { %p2753_p2 = pnand %p2751_p6, %p3175_p8 }
  0x7a   : > { %p2754_p11 = pneg %p2753_p2 }
  0x7c   : > { %p2759_p7 = pnand %p2757_p5, %p2754_p11 }
  0x7e   : > { %2762 = shalt.err (!%p2759_p7)
}
  0x7f   : > { %s2763_s17 = scalar_lea.vmem %s3260_s22, 16  ;;  %s2770_s14 = scalar_lea.vmem %s3260_s22, 32 }
  0x80   : > { %p2764_p9 = scmp.ne.s32.totalorder %s3260_s22, %s2763_s17  ;;  %p2771_p10 = scmp.lt.s32.totalorder %s3260_s22, %s3260_s22 }
  0x81   : > { %p2772_p3 = scmp.lt.s32.totalorder %s2770_s14, %s2763_s17 }
  0x82   : > { %p2766_p13 = pnand %p2764_p9, %p3175_p8 }
  0x83   : > { %p2773_p4 = por %p2772_p3, %p2771_p10 }
  0x84   : > { %p2767_p1 = pneg %p2766_p13 }
  0x86   : > { %p2774_p12 = pnand %p2773_p4, %p2767_p1 }
  0x88   : > { %2777 = shalt.err (!%p2774_p12)
}
  0x89   : > { %p3983_p0 = scmp.ne.s32.totalorder %s3969_s15, 0  ;;  %s3035_s19 = smov [#allocation11]  }
  0x8a   : > { %s269_s20 = sshll.u32 %s3035_s19, 4  ;;  %s3984_s5 = sld [smem:[#allocation40_spill]]  ;;  %s270_s20 = int_to_ptr.vmem [resolvable:$true] %s269_s20 }
  0x8b   : > { %2545 = dma.hbm_to_vmem [thread:$0]  (!%p3983_p0), %s3982_s4, 16, %s3260_s22, [#allocation9]  }
  0x90   : > { %s2778_s2 = scalar_lea.hbm %s3984_s5, 4608 }
  0x91   : > { %p2779_p6 = scmp.ne.s32.totalorder %s3984_s5, %s2778_s2  ;;  %p2785_p5 = scmp.lt.u32.totalorder %s2778_s2, %s3984_s5 }
  0x93   : > { %p2781_p2 = pnand %p2779_p6, %p3175_p8 }
  0x95   : > { %p2782_p11 = pneg %p2781_p2 }
  0x97   : > { %p2787_p7 = pnand %p2785_p5, %p2782_p11 }
  0x99   : > { %2790 = shalt.err (!%p2787_p7)
}
  0x9a   : > { %s2791_s22 = scalar_lea.vmem %s270_s20, 4608  ;;  %p2799_p10 = scmp.lt.s32.totalorder %s270_s20, %s270_s20 }
  0x9b   : > { %p2792_p9 = scmp.ne.s32.totalorder %s270_s20, %s2791_s22  ;;  %p2800_p3 = scmp.lt.s32.totalorder %s2791_s22, %s2791_s22 }
  0x9d   : > { %p2794_p13 = pnand %p2792_p9, %p3175_p8  ;;  %p2801_p4 = por %p2800_p3, %p2799_p10 }
  0x9f   : > { %p2795_p1 = pneg %p2794_p13 }
  0xa1   : > { %p2802_p12 = pnand %p2801_p4, %p2795_p1 }
  0xa3   : > { %2805 = shalt.err (!%p2802_p12)
}
  0xa4   : > { %s3036_s16 = smov 128   ;;  %s3037_s13 = smov 8  }
  0xa5   : > { %2548 = dma.hbm_to_vmem [thread:$0]  (!%p3983_p0), %s3984_s5, 4608, %s270_s20, [#allocation12], %s3036_s16, %s3036_s16, %s3037_s13  }
  0xa6   : > { %s1945_s19 = sadd.s32 4294967294, %s3028_s10   ;;  %s48_s3 = sadd.s32 1, %s3008_s29 }
  0xa7   : > { %p3985_p8 = scmp.eq.s32.totalorder %s3211_s30, 0  ;;  %p55_p6 = scmp.ne.s32.totalorder %s3008_s29, %s3004_s28 }
  0xa8   : > { %p61_p2 = scmp.ne.s32.totalorder %s3004_s28, %s3000_s27  ;;  %p228_p11 = scmp.eq.s32.totalorder %s1945_s19, 7 }
  0xa9   : > { %s3340_s12 = scalar_select %p3985_p8, %s3008_s29, %s48_s3  }
  0xaa   : > { %s283_s2 = sand.u32 1, %s3008_s29   ;;  %p3987_p5 = scmp.eq.s32.totalorder %s3028_s10, 0 }
  0xab   : > { %3986 = sst [smem:[#allocation34_spill]] %s3340_s12  ;;  %p3988_p9 = scmp.eq.s32.totalorder %s3149_s11, 0 }
  0xac   : > { %p57_p7 = por %p3987_p5, %p55_p6  ;;  %p3990_p1 = scmp.eq.s32.totalorder %s3149_s11, 7 }
  0xad   : > { %p3351_p13 = por %p3988_p9, %p61_p2  ;;  %p3361_p0 = por %p228_p11, %p61_p2 }
  0xae   : > { %p3357_p10 = por %p3990_p1, %p55_p6  ;;  %s1957_s20 = sshll.u32 %s283_s2, 5 }
  0xaf   : > { %s3992_s30 = scalar_select %p3361_p0, 1, 0 }
  0xb0   : > { %s3991_s15 = scalar_select %p3357_p10, 1, 0 }
  0xb1   : > { %s2062_s17 = sshll.u32 %s3020_s8, 3  ;;  %s287_s22 = scalar_lea.vmem [#allocation2], %s1957_s20 }
  0xb2   : > { %s294_s14 = sadd.s32 %s2062_s17, %s3240_s18  ;;  %s297_s16 = sshll.u32 %s287_s22, 4  ;;  %s3367_s16 = int_to_ptr.vmem [resolvable:$true] %s297_s16 }
  0xb3   : > { %s1961_s13 = sshll.u32 %s294_s14, 6  ;;  %s3993_s19 = sld [smem:[#allocation35_spill]] }
  0xb4   : > { %p3994_p3 = scmp.lt.s32.totalorder %s3028_s10, 8  ;;  %s3380_s20 = scalar_lea.sflag [#allocation3], %s283_s2 }
  0xb6   : > { %p3376_p4 = pnand %p3994_p3, %p57_p7 }
  0xb8   : > { %p2808_p8 = pneg %p3376_p4 }
  0xb9   : > { %s3372_s3 = scalar_lea.hbm %s3993_s19, %s1961_s13  ;;  %s2811_s13 = scalar_lea.hbm %s3993_s19, 4096 }
  0xba   : > { %s2806_s17 = scalar_lea.hbm %s3372_s3, 512  ;;  %p2812_p11 = scmp.lt.u32.totalorder %s3372_s3, %s3993_s19 }
  0xbb   : > { %p2807_p12 = scmp.ne.s32.totalorder %s3372_s3, %s2806_s17  ;;  %p2813_p5 = scmp.lt.u32.totalorder %s2811_s13, %s2806_s17 }
  0xbc   : > { %p2815_p9 = scmp.lt.u32.totalorder %s2806_s17, %s3372_s3 }
  0xbd   : > { %p2809_p6 = pnand %p2808_p8, %p2807_p12  ;;  %p2814_p7 = por %p2813_p5, %p2812_p11 }
  0xbf   : > { %p2810_p2 = pneg %p2809_p6  ;;  %p2816_p1 = por %p2815_p9, %p2814_p7 }
  0xc1   : > { %p2817_p3 = pnand %p2816_p1, %p2810_p2 }
  0xc3   : > { %2820 = shalt.err (!%p2817_p3)
}
  0xc4   : > { %s2821_s2 = scalar_lea.vmem %s3367_s16, 512  ;;  %s3038_s14 = smov [#allocation2]  }
  0xc5   : > { %p2822_p12 = scmp.ne.s32.totalorder %s3367_s16, %s2821_s2  ;;  %s2826_s22 = sshll.u32 %s3038_s14, 4  ;;  %s2827_s22 = int_to_ptr.vmem [resolvable:$false] %s2826_s22 }
  0xc6   : > { %s2828_s23 = scalar_lea.vmem %s2827_s22, 1024  ;;  %p2829_p10 = scmp.lt.s32.totalorder %s3367_s16, %s2827_s22 }
  0xc7   : > { %p2824_p6 = pnand %p2822_p12, %p2808_p8  ;;  %p2830_p11 = scmp.lt.s32.totalorder %s2828_s23, %s2821_s2 }
  0xc9   : > { %p2825_p0 = pneg %p2824_p6  ;;  %p2831_p5 = por %p2830_p11, %p2829_p10 }
  0xcb   : > { %p2832_p7 = pnand %p2831_p5, %p2825_p0 }
  0xcd   : > { %2835 = shalt.err (!%p2832_p7)
}
  0xce   : > { %s3996_s17 = smov 4   ;;  %s3997_s13 = smov 64  }
  0xcf   : > { %s3998_s7 = sld [smem:[#allocation22_spill]]  ;;  %s3999_s1 = sld [smem:[#allocation32_spill]] }
  0xd0   : > { %s4000_s14 = sld [smem:[#allocation21_spill]]  ;;  %s4002_s2 = sld [smem:[#allocation31_spill]] }
  0xd1   : > { %s4001_s22 = sld [smem:[#allocation20_spill]]  ;;  %p4004_p0 = scmp.lt.s32.totalorder %s3232_s21, 15 }
  0xd2   : > { %2552 = dma.hbm_to_vmem [thread:$0]  (!%p3376_p4), %s3372_s3, 512, %s3367_s16, %s3380_s20, %s3997_s13, %s3997_s13, %s3996_s17  }
  0xd3   : > { %s4062_s21 = smov (!%p4004_p0, %s3232_s21), 15  ;;  %p4005_p9 = scmp.eq.s32.totalorder %s3028_s10, 0 }
  0xd4   : > { %p4006_p12 = scmp.eq.s32.totalorder %s3149_s11, 0  ;;  %s4008_s12 = sld [smem:[#allocation37_spill]] }
  0xd5   : > { %s120_s6 = sadd.s32 1, %s3998_s7  ;;  %p4003_p10 = scmp.lt.s32.totalorder %s3999_s1, 15 }
  0xd6   : > { %p127_p8 = scmp.ne.s32.totalorder %s3998_s7, %s4000_s14  ;;  %s336_s4 = sand.u32 1, %s3998_s7  }
  0xd7   : > { %s4060_s1 = smov (!%p4003_p10, %s3999_s1), 15  ;;  %p133_p2 = scmp.ne.s32.totalorder %s4000_s14, %s4001_s22 }
  0xd8   : > { %s116_s23 = ssub.s32 %s4060_s1, %s4062_s21  ;;  %p129_p1 = por %p127_p8, %p4005_p9 }
  0xd9   : > { %s117_s5 = sor.u32 %s116_s23, %s4002_s2  ;;  %p3428_p6 = por %p133_p2, %p4006_p12 }
  0xda   : > { %p118_p3 = scmp.eq.s32.totalorder %s117_s5, 0  ;;  %s1968_s16 = sshll.u32 %s336_s4, 3 }
  0xdb   : > { %s4007_s19 = scalar_select %p3428_p6, 1, 0 }
  0xdc   : > { %s1970_s3 = sshll.u32 %s4060_s1, 1  ;;  %s4064_s7 = smov (!%p118_p3, %s3998_s7), %s120_s6 }
  0xdd   : > { %s348_s20 = sadd.s32 %s1970_s3, %s3240_s18  ;;  %s338_s8 = scalar_lea.vmem [#allocation7], %s1968_s16 }
  0xde   : > { %s1972_s9 = sshll.u32 %s348_s20, 6  ;;  %s351_s14 = sshll.u32 %s338_s8, 4  ;;  %s3441_s14 = int_to_ptr.vmem [resolvable:$true] %s351_s14 }
  0xdf   : > { %s3439_s2 = scalar_lea.hbm %s4008_s12, %s1972_s9  ;;  %p4009_p4 = scmp.lt.s32.totalorder %s3028_s10, 8 }
  0xe0   : > { %s2836_s4 = scalar_lea.hbm %s3439_s2, 128  ;;  %s2841_s9 = scalar_lea.hbm %s4008_s12, 4096 }
  0xe1   : > { %p3445_p11 = pnand %p4009_p4, %p129_p1  ;;  %p2837_p5 = scmp.ne.s32.totalorder %s3439_s2, %s2836_s4 }
  0xe2   : > { %p2842_p8 = scmp.lt.u32.totalorder %s3439_s2, %s4008_s12  ;;  %p2843_p2 = scmp.lt.u32.totalorder %s2841_s9, %s2836_s4 }
  0xe3   : > { %p2838_p7 = pneg %p3445_p11  ;;  %p2845_p1 = scmp.lt.u32.totalorder %s2836_s4, %s3439_s2 }
  0xe4   : > { %p2844_p9 = por %p2843_p2, %p2842_p8 }
  0xe5   : > { %p2839_p10 = pnand %p2838_p7, %p2837_p5 }
  0xe6   : > { %p2846_p3 = por %p2845_p1, %p2844_p9 }
  0xe7   : > { %p2840_p0 = pneg %p2839_p10 }
  0xe9   : > { %p2847_p12 = pnand %p2846_p3, %p2840_p0 }
  0xeb   : > { %2850 = shalt.err (!%p2847_p12)
}
  0xec   : > { %s2851_s23 = scalar_lea.vmem %s3441_s14, 128  ;;  %s3039_s16 = smov [#allocation7]  }
  0xed   : > { %p2852_p4 = scmp.ne.s32.totalorder %s3441_s14, %s2851_s23  ;;  %s2856_s3 = sshll.u32 %s3039_s16, 4  ;;  %s2857_s3 = int_to_ptr.vmem [resolvable:$false] %s2856_s3 }
  0xee   : > { %s2858_s20 = scalar_lea.vmem %s2857_s3, 256  ;;  %p2859_p6 = scmp.lt.s32.totalorder %s3441_s14, %s2857_s3 }
  0xef   : > { %p2854_p5 = pnand %p2852_p4, %p2838_p7  ;;  %p2860_p8 = scmp.lt.s32.totalorder %s2858_s20, %s2851_s23 }
  0xf1   : > { %p2855_p10 = pneg %p2854_p5  ;;  %p2861_p2 = por %p2860_p8, %p2859_p6 }
  0xf3   : > { %p2862_p9 = pnand %p2861_p2, %p2855_p10 }
  0xf5   : > { %2865 = shalt.err (!%p2862_p9)
}
  0xf6   : > { %2558 = dma.hbm_to_vmem [thread:$0]  (!%p3445_p11), %s3439_s2, 128, %s3441_s14, %s3262_s0, %s3997_s13, %s3997_s13, %s3996_s17  }
  0xf7   : > { %s4011_s22 = sld [smem:[#allocation28_spill]] }
  0xfd   : > { %p4012_p7 = scmp.ne.s32.totalorder %s4011_s22, 0 }
  0xfe   : > { %s3481_s21 = sand.u32 (!%p4012_p7), 1, %s3004_s28  }
  0xff   : > { %363 = sbr.rel (%p4012_p7) target bundleno = 604 (0x25c), region = 44  ;;  %s1974_s4 = sshll.u32 (!%p4012_p7), %s3481_s21, 5 }
 0x100   : > { %s366_s5 = scalar_lea.sflag (!%p4012_p7), [#allocation3], %s3481_s21  ;;  %s3485_s8 = scalar_lea.vmem (!%p4012_p7), [#allocation2], %s1974_s4 }
 0x106   : > { %2951 = dma.done.wait (%p3351_p13), %s366_s5, 512  }
 0x107   : > { %2953 = vsyncadd (%p3351_p13), %s366_s5, 4294966784  ;;  %s4013_s0 = sld [smem:[#allocation23_spill]]  ;;  %s4014_s17 = sld [smem:[#allocation33_spill]] }
 0x108   : > { %s374_s13 = sand.u32 1, %s3149_s11  }
 0x109   : > { %s375_s1 = scalar_lea.sflag [#allocation6], %s374_s13 }
 0x10d   : > { %s376_s14 = sand.u32 1, %s4013_s0   ;;  %p4015_p6 = scmp.ne.s32.totalorder %s4014_s17, 0 }
 0x10e   : > { %s1975_s2 = sshll.u32 %s376_s14, 3 }
 0x10f   : > { %s378_s9 = scalar_lea.vmem [#allocation5], %s1975_s2 }
 0x110   : > { %2955 = dma.done.wait (%p4015_p6), %s375_s1, 128  }
 0x111   : > { %2957 = vsyncadd (%p4015_p6), %s375_s1, 4294967168  ;;  %s4016_s18 = sld [smem:[#allocation21_spill]]  ;;  %p4017_p13 = scmp.ne.s32.totalorder %s4007_s19, 0 }
 0x117   : > { %s385_s6 = sand.u32 1, %s4016_s18  }
 0x118   : > { %s3498_s23 = sshll.u32 %s385_s6, 3 }
 0x119   : > { %s387_s25 = scalar_lea.vmem [#allocation7], %s3498_s23 }
 0x11a   : > { %2959 = dma.done.wait (%p4017_p13), %s375_s1, 128  }
 0x11b   : > { %2961 = vsyncadd (%p4017_p13), %s375_s1, 4294967168  ;;  %p4018_p11 = scmp.eq.s32.totalorder %s3149_s11, 0 }
 0x11d   : > { %2963 = dma.done.wait (%p4018_p11), [#allocation9], 32   ;;  %p4019_p0 = pmov %p4018_p11 }
 0x11f   : > { %2965 = vsyncadd (%p4019_p0), [#allocation9], 4294967264  ;;  %p4020_p1 = pmov %p4019_p0 }
 0x120   : > { %p4021_p3 = pmov %p4019_p0 }
 0x121   : > { %2967 = dma.done.wait (%p4020_p1), [#allocation12], 4608  }
 0x122   : > { %2969 = vsyncadd (%p4021_p3), [#allocation12], 4294962688  ;;  %s4022_s16 = sld [smem:[#allocation24_spill]]  ;;  %v601_v0 = vld [vmem:[#allocation11 + $0x20] sm:$0xff]  ;;  %v602_v1 = vld [vmem:[#allocation11 + $0x28] sm:$0xff]  ;;  %vm605_vm1 = vcmask 261120  }
 0x123   : > { %v1126_v2 = vld [vmem:[#allocation11 + $0x80] sm:$0xff]  ;;  %v2379_v3 = vpack.c.bf16 %v602_v1, %v601_v0  ;;  %v1127_v4 = vld [vmem:[#allocation11 + $0x88] sm:$0xff]  ;;  %v603_v5 = vld [vmem:[#allocation11 + $0x30] sm:$0xff]  ;;  %vm575_vm2 = vcmask 1046528   ;;  %vm554_vm3 = vcmask 1040384   ;;  %s4027_s3 = sld [smem:[#allocation25_spill]] }
 0x124   : > { %v604_v6 = vld [vmem:[#allocation11 + $0x38] sm:$0xff]  ;;  %v3516_v7 = vpack.c.bf16 %v1127_v4, %v1126_v2  ;;  %v1128_v9 = vld [vmem:[#allocation11 + $0x90] sm:$0xff]  ;;  %v596_v19 = vld [vmem:[#allocation11] sm:$0xff]  ;;  %s1980_s20 = sshll.u32 %s3481_s21, 6  ;;  %vm1750_vm5 = vcmask 64512   ;;  %s4028_s2 = sld [smem:[#allocation41_spill]] }
 0x125   : > { %v2383_v8 = vpack.c.bf16 %v604_v6, %v603_v5  ;;  %v1129_v10 = vld [vmem:[#allocation11 + $0x98] sm:$0xff]  ;;  %2380 = vmatprep.subr.bf16.mxu1 %v2379_v3  ;;  %v597_v20 = vld [vmem:[#allocation11 + $0x8] sm:$0xff]  ;;  %v1248_v22 = vld [vmem:[#allocation11 + $0xa0] sm:$0xff]  ;;  %s3810_s22 = scalar_lea.vmem [#allocation13], %s1980_s20  ;;  %p4029_p10 = scmp.ne.s32.totalorder %s3991_s15, 0 }
 0x126   : > { %v2081_v11 = vld [vmem:[%s378_s9] sm:$0xff]   ;;  %v3518_v12 = vpack.c.bf16 %v1129_v10, %v1128_v9  ;;  %2412 = vmatprep.subr.bf16.mxu0 %v3516_v7  ;;  %2382 = vmatpush3.bf16.msra.mxu1 %v2379_v3  ;;  %v2387_v26 = vpack.c.bf16 %v597_v20, %v596_v19  ;;  %v2089_v36 = vld [vmem:[%s3485_s8 + $0x10] sm:$0xff]   ;;  %v2090_v5 = vld [vmem:[%s3485_s8 + $0x18] sm:$0xff]   ;;  %s1776_s17 = sshll.u32 %s3810_s22, 4  ;;  %s1760_s9 = scalar_lea.sflag [#allocation4], %s3481_s21  ;;  %s3832_s17 = int_to_ptr.vmem [resolvable:$true] %s1776_s17 }
 0x127   : > { %v2082_v13 = vunpack.c.l.bf16 %v2081_v11  ;;  %v3520_v14 = vld [vmem:[#allocation8] ss:$0 sm:$0xff]  ;;  %v3522_v15 = vld [vmem:[#allocation10] ss:$0 sm:$0xff]  ;;  %v2083_v17 = vunpack.c.h.bf16 %v2081_v11  ;;  %2414 = vmatpush3.bf16.msra.mxu0 %v3516_v7  ;;  %2384 = vmatprep.subr.bf16.mxu1 %v2383_v8  ;;  %v1249_v27 = vld [vmem:[#allocation11 + $0xa8] sm:$0xff]  ;;  %v2074_v51 = vunpack.c.l.bf16 %v2089_v36  ;;  %v2075_v55 = vunpack.c.h.bf16 %v2089_v36  ;;  %s2866_s18 = scalar_lea.vmem %s3832_s17, 1024 }
 0x128   : > { %p522_p12 = scmp.gt.s32.totalorder %s4022_s16, 0  ;;  %v2065_v16 = vld [vmem:[%s3485_s8] sm:$0xff]   ;;  %v2088_v28 = vld [vmem:[%s3485_s8 + $0x8] sm:$0xff]   ;;  %2416 = vmatprep.subr.bf16.mxu0 %v3518_v12  ;;  %v2419_v31 = vpack.c.bf16 %v1249_v27, %v1248_v22  ;;  %v1250_v41 = vld [vmem:[#allocation11 + $0xb0] sm:$0xff]  ;;  %v2078_v20 = vunpack.c.l.bf16 %v2090_v5  ;;  %p526_p4 = scmp.lt.s32.totalorder %s4022_s16, 3 }
 0x129   : > { %v2066_v18 = vunpack.c.l.bf16 %v2065_v16  ;;  %v2067_v21 = vunpack.c.h.bf16 %v2065_v16  ;;  %v479_v23 = vmul.f32 %v2082_v13, %v3520_v14  ;;  %v480_v25 = vmul.f32 %v2083_v17, %v3520_v14  ;;  %v1251_v45 = vld [vmem:[#allocation11 + $0xb8] sm:$0xff]  ;;  %v598_v46 = vld [vmem:[#allocation11 + $0x10] sm:$0xff]  ;;  %v1383_v58 = vld [vmem:[#allocation11 + $0xc0] sm:$0xff]  ;;  %s2063_s4 = sshll.u32 %s4022_s16, 3  ;;  %s2058_s5 = sshll.u32 %s4027_s3, 5 }
 0x12a   : > { %s3514_s19 = scalar_select %p522_p12, 1, 0  ;;  %v2070_v32 = vunpack.c.l.bf16 %v2088_v28  ;;  %v2071_v35 = vunpack.c.h.bf16 %v2088_v28  ;;  %2386 = vmatpush3.bf16.msra.mxu1 %v2383_v8  ;;  %v599_v47 = vld [vmem:[#allocation11 + $0x18] sm:$0xff]  ;;  %v2423_v56 = vpack.c.bf16 %v1251_v45, %v1250_v41  ;;  %v1384_v59 = vld [vmem:[#allocation11 + $0xc8] sm:$0xff]  ;;  %v485_v0 = vmul.f32 %v2074_v51, %v3520_v14  ;;  %v853_v10 = vld [vmem:[#allocation11 + $0x40] sm:$0xff] }
 0x12b   : > { %v481_v29 = vmul.f32 %v2066_v18, %v3520_v14  ;;  %v482_v30 = vmul.f32 %v2067_v21, %v3520_v14  ;;  %v498_v33 = vadd.f32 %v3522_v15, %v479_v23  ;;  %v499_v34 = vadd.f32 %v3522_v15, %v480_v25  ;;  %2418 = vmatpush3.bf16.msra.mxu0 %v3518_v12  ;;  %v854_v11 = vld [vmem:[#allocation11 + $0x48] sm:$0xff]  ;;  %v1385_v13 = vld [vmem:[#allocation11 + $0xd0] sm:$0xff]  ;;  %v1386_v16 = vld [vmem:[#allocation11 + $0xd8] sm:$0xff]  ;;  %s527_s11 = scalar_select %p526_p4, 1, 0 }
 0x12c   : > { %v524_v24 = vstv %s3514_s19  ;;  %v483_v40 = vmul.f32 %v2070_v32, %v3520_v14  ;;  %2388 = vmatprep.subr.bf16.mxu1 %v2387_v26  ;;  %v484_v44 = vmul.f32 %v2071_v35, %v3520_v14  ;;  %2420 = vmatprep.subr.bf16.mxu0 %v2419_v31  ;;  %v2391_v57 = vpack.c.bf16 %v599_v47, %v598_v46  ;;  %v1506_v32 = vld [vmem:[#allocation11 + $0xe0] sm:$0xff]  ;;  %v855_v41 = vld [vmem:[#allocation11 + $0x50] sm:$0xff]  ;;  %s1773_s8 = sadd.s32 %s2063_s4, %s2058_s5  ;;  %p2867_p5 = scmp.ne.s32.totalorder %s3832_s17, %s2866_s18 }
 0x12d   : > { %vm3537_vm0 = vcmp.eq.s32.totalorder %v524_v24, 1  ;;  %v500_v38 = vadd.f32 %v3522_v15, %v481_v29  ;;  %v501_v39 = vadd.f32 %v3522_v15, %v482_v30  ;;  %v510_v42 = vmax.f32 %v498_v33, 0.0  ;;  %v1507_v33 = vld [vmem:[#allocation11 + $0xe8] sm:$0xff]  ;;  %s2059_s0 = sshll.u32 %s1773_s8, 7  ;;  %s3040_s6 = smov [#allocation13]  }
 0x12e   : > { %v511_v43 = vmax.f32 %v499_v34, 0.0  ;;  %v502_v50 = vadd.f32 %v3522_v15, %v483_v40  ;;  %v503_v54 = vadd.f32 %v3522_v15, %v484_v44  ;;  %v486_v1 = vmul.f32 %v2075_v55, %v3520_v14  ;;  %v2085_v34 = vld [vmem:[%s387_s25] sm:$0xff]   ;;  %s3830_s1 = scalar_lea.hbm %s4028_s2, %s2059_s0  ;;  %p2868_p8 = pnand %p2867_p5, %p4029_p10 }
 0x12f   : > { %v3546_v48 = vmax.f32 %v500_v38, 0.0  ;;  %v3548_v49 = vmax.f32 %v501_v39, 0.0  ;;  %v3553_v52 = vsel %vm3537_vm0, %v510_v42, 0.0  ;;  %v2427_v2 = vpack.c.bf16 %v1384_v59, %v1383_v58  ;;  %v856_v42 = vld [vmem:[#allocation11 + $0x58] sm:$0xff]  ;;  %s2870_s23 = sshll.u32 %s3040_s6, 4  ;;  %s2871_s23 = int_to_ptr.vmem [resolvable:$false] %s2870_s23 }
 0x130   : > { %v3557_v53 = vsel %vm3537_vm0, %v511_v43, 0.0  ;;  %2207 = vmatprep.mubr.msk.f32.mxu1 %vm605_vm1, %v3553_v52  ;;  %v3568_v60 = vmax.f32 %v502_v50, 0.0  ;;  %v3570_v61 = vmax.f32 %v503_v54, 0.0  ;;  %v504_v8 = vadd.f32 %v3522_v15, %v485_v0  ;;  %p2869_p2 = pneg %p2868_p8  ;;  %s2872_s25 = scalar_lea.vmem %s2871_s23, 2048 }
 0x131   : > { %2287 = vmatprep.mubr.msk.f32.mxu0 %vm605_vm1, %v3546_v48  ;;  %2208 = vmatmul.mubr.msk.f32.vlgmr.msra.gmra.mrb[0].mxu1 %vm605_vm1, %v3557_v53  ;;  %v579_v62 = vrot.slane %v3546_v48, 1  ;;  %v580_v63 = vrot.slane %v3548_v49, 1  ;;  %v505_v9 = vadd.f32 %v3522_v15, %v486_v1  ;;  %v555_v21 = vrot.slane %v3553_v52, 7  ;;  %p2873_p9 = scmp.lt.s32.totalorder %s3832_s17, %s2871_s23  ;;  %p2874_p7 = scmp.lt.s32.totalorder %s2872_s25, %s2866_s18 }
 0x132   : > { %2288 = vmatmul.mubr.msk.f32.vlgmr.msra.gmra.mrb[0].mxu0 %vm605_vm1, %v3548_v49  ;;  %2390 = vmatpush3.bf16.msra.mxu1 %v2387_v26  ;;  %v582_v3 = vrot.slane %v3568_v60, 1  ;;  %v583_v4 = vrot.slane %v3570_v61, 1  ;;  %v3597_v18 = vmax.f32 %v504_v8, 0.0  ;;  %v2395_v23 = vpack.c.bf16 %v854_v11, %v853_v10  ;;  %v1508_v10 = vld [vmem:[#allocation11 + $0xf0] sm:$0xff]  ;;  %v1509_v11 = vld [vmem:[#allocation11 + $0xf8] sm:$0xff] }
 0x133   : > { %2422 = vmatpush3.bf16.msra.mxu0 %v2419_v31  ;;  %2210 = vmatprep.mubr.msk.f32.mxu1 %vm605_vm1, %v3546_v48  ;;  %v3584_v6 = vsel %vm575_vm2, %v579_v62, %v580_v63  ;;  %v3595_v17 = vsel %vm575_vm2, %v580_v63, 0.0  ;;  %v3599_v19 = vmax.f32 %v505_v9, 0.0  ;;  %v2079_v24 = vunpack.c.h.bf16 %v2090_v5  ;;  %v1003_v62 = vld [vmem:[#allocation11 + $0x60] sm:$0xff]  ;;  %v1004_v63 = vld [vmem:[#allocation11 + $0x68] sm:$0xff]  ;;  %p2875_p6 = por %p2874_p7, %p2873_p9 }
 0x134   : > { %2290 = vmatprep.mubr.msk.f32.mxu0 %vm605_vm1, %v3568_v60  ;;  %2424 = vmatprep.subr.bf16.mxu0 %v2423_v56  ;;  %v3605_v22 = vsel %vm575_vm2, %v582_v3, %v583_v4  ;;  %v585_v25 = vrot.slane %v3597_v18, 1  ;;  %v2431_v27 = vpack.c.bf16 %v1386_v16, %v1385_v13  ;;  %v487_v28 = vmul.f32 %v2078_v20, %v3520_v14 }
 0x135   : > { %2392 = vmatprep.subr.bf16.mxu1 %v2391_v57  ;;  %2211 = vmatmul.mubr.msk.f32.gmra.mrb[2].mxu1 %vm605_vm1, %v3548_v49  ;;  %v586_v26 = vrot.slane %v3599_v19, 1  ;;  %v556_v29 = vrot.slane %v3557_v53, 7  ;;  %v558_v30 = vrot.slane %v3546_v48, 7  ;;  %v488_v31 = vmul.f32 %v2079_v24, %v3520_v14  ;;  %p2876_p13 = pnand %p2875_p6, %p2869_p2 }
 0x136   : > { %2291 = vmatmul.mubr.msk.f32.gmra.mrb[2].mxu0 %vm605_vm1, %v3570_v61  ;;  %2213 = vmatprep.mubr.msk.f32.mxu1 %vm605_vm1, %v3568_v60  ;;  %v3622_v35 = vsel %vm575_vm2, %v583_v4, 0.0  ;;  %v506_v36 = vadd.f32 %v3522_v15, %v487_v28  ;;  %v571_v37 = vsel %vm554_vm3, 0.0, %v555_v21  ;;  %v2435_v43 = vpack.c.bf16 %v1507_v33, %v1506_v32  ;;  %v1629_v28 = vld [vmem:[#allocation11 + $0x108] sm:$0xff] }
 0x137   : > { %2426 = vmatpush3.bf16.msra.mxu0 %v2423_v56  ;;  %2307 = vmatprep.mubr.msk.f32.mxu0 %vm605_vm1, %v3584_v6  ;;  %v3630_v38 = vsel %vm575_vm2, %v585_v25, %v586_v26  ;;  %v507_v39 = vadd.f32 %v3522_v15, %v488_v31  ;;  %v2086_v44 = vunpack.c.l.bf16 %v2085_v34  ;;  %v557_v45 = vsel %vm554_vm3, %v555_v21, %v556_v29 }
 0x138   : > { %2428 = vmatprep.subr.bf16.mxu0 %v2427_v2  ;;  %2394 = vmatpush3.bf16.msra.mxu1 %v2391_v57  ;;  %v3633_v40 = vmax.f32 %v506_v36, 0.0  ;;  %v3641_v46 = vsel %vm554_vm3, 0.0, %v558_v30  ;;  %v2087_v48 = vunpack.c.h.bf16 %v2085_v34  ;;  %v3649_v50 = vsel %vm575_vm2, %v586_v26, 0.0  ;;  %v1005_v36 = vld [vmem:[#allocation11 + $0x70] sm:$0xff] }
 0x139   : > { %2214 = vmatmul.mubr.msk.f32.gmra.mrb[4].mxu1 %vm605_vm1, %v3570_v61  ;;  %2396 = vmatprep.subr.bf16.mxu1 %v2395_v23  ;;  %v3643_v47 = vmax.f32 %v507_v39, 0.0  ;;  %v559_v54 = vrot.slane %v3548_v49, 7  ;;  %v489_v55 = vmul.f32 %v2086_v44, %v3520_v14  ;;  %v561_v57 = vrot.slane %v3568_v60, 7 }
 0x13a   : > { %2308 = vmatmul.mubr.msk.f32.vlgmr.msra.gmra.mrb[0].mxu0 %vm605_vm1, %v3595_v17  ;;  %2216 = vmatprep.mubr.msk.f32.mxu1 %vm605_vm1, %v3597_v18  ;;  %v997_v51 = vrot.slane %v3633_v40, 1  ;;  %v2399_v58 = vpack.c.bf16 %v856_v42, %v855_v41  ;;  %v490_v59 = vmul.f32 %v2087_v48, %v3520_v14  ;;  %v528_v3 = vstv %s527_s11 }
 0x13b   : > { %2430 = vmatpush3.bf16.msra.mxu0 %v2427_v2  ;;  %2310 = vmatprep.mubr.msk.f32.mxu0 %vm605_vm1, %v3605_v22  ;;  %v998_v56 = vrot.slane %v3643_v47, 1  ;;  %v508_v0 = vadd.f32 %v3522_v15, %v489_v55  ;;  %v3669_v1 = vsel %vm554_vm3, %v558_v30, %v559_v54  ;;  %v562_v2 = vrot.slane %v3570_v61, 7  ;;  %v1631_v54 = vld [vmem:[#allocation11 + $0x118] sm:$0xff] }
 0x13c   : > { %2432 = vmatprep.subr.bf16.mxu0 %v2431_v27  ;;  %v3678_v4 = vsel %vm554_vm3, 0.0, %v561_v57  ;;  %v564_v5 = vrot.slane %v3597_v18, 7  ;;  %v509_v8 = vadd.f32 %v3522_v15, %v490_v59  ;;  %v2403_v9 = vpack.c.bf16 %v1004_v63, %v1003_v62 }
 0x13d   : > { %2217 = vmatmul.mubr.msk.f32.gmra.mrb[6].mxu1 %vm605_vm1, %v3599_v19  ;;  %v3663_v49 = vsel %vm575_vm2, %v997_v51, %v998_v56  ;;  %v3672_v14 = vsel %vm575_vm2, %v998_v56, 0.0  ;;  %v520_v13 = vmax.f32 %v508_v0, 0.0  ;;  %vm3686_vm4 = vcmp.eq.s32.totalorder %v528_v3, 1  ;;  %v1630_v51 = vld [vmem:[#allocation11 + $0x110] sm:$0xff] }
 0x13e   : > { %2311 = vmatmul.mubr.msk.f32.gmra.mrb[2].mxu0 %vm605_vm1, %v3622_v35  ;;  %2227 = vmatprep.mubr.msk.f32.mxu1 %vm605_vm1, %v571_v37  ;;  %v576_v20 = vrot.slane %v3553_v52, 1  ;;  %v577_v21 = vrot.slane %v3557_v53, 1  ;;  %v3697_v15 = vsel %vm554_vm3, %v561_v57, %v562_v2  ;;  %v3701_v24 = vsel %vm554_vm3, 0.0, %v564_v5  ;;  %v1006_v37 = vld [vmem:[#allocation11 + $0x78] sm:$0xff] }
 0x13f   : > { %2313 = vmatprep.mubr.msk.f32.mxu0 %vm605_vm1, %v3630_v38  ;;  %2434 = vmatpush3.bf16.msra.mxu0 %v2431_v27  ;;  %v992_v25 = vrot.slane %v3633_v40, 7  ;;  %v2439_v52 = vpack.c.bf16 %v1509_v11, %v1508_v10  ;;  %v521_v26 = vmax.f32 %v509_v8, 0.0  ;;  %v3710_v53 = vsel %vm3686_vm4, %v520_v13, 0.0  ;;  %v1628_v27 = vld [vmem:[#allocation11 + $0x100] sm:$0xff] }
 0x140   : > { %2436 = vmatprep.subr.bf16.mxu0 %v2435_v43  ;;  %v993_v30 = vrot.slane %v3643_v47, 7  ;;  %v578_v31 = vsel %vm575_vm2, %v576_v20, %v577_v21  ;;  %v1372_v34 = vrot.slane %v3710_v53, 7  ;;  %v2443_v39 = vpack.c.bf16 %v1629_v28, %v1628_v27 }
 0x141   : > { %2228 = vmatmul.mubr.msk.f32.vlgmr.msra.gmra.mrb[0].mxu1 %vm605_vm1, %v557_v45  ;;  %v996_v32 = vsel %vm554_vm3, 0.0, %v992_v25  ;;  %v3722_v33 = vsel %vm3686_vm4, %v521_v26, 0.0  ;;  %v592_v41 = vsel %vm575_vm2, %v577_v21, 0.0  ;;  %v2407_v44 = vpack.c.bf16 %v1006_v37, %v1005_v36 }
 0x142   : > { %2314 = vmatmul.mubr.msk.f32.gmra.mrb[4].mxu0 %vm605_vm1, %v3649_v50  ;;  %2398 = vmatpush3.bf16.msra.mxu1 %v2395_v23  ;;  %v565_v23 = vrot.slane %v3599_v19, 7  ;;  %v994_v42 = vsel %vm554_vm3, %v992_v25, %v993_v30  ;;  %v1376_v45 = vsel %vm554_vm3, 0.0, %v1372_v34 }
 0x143   : > { %2230 = vmatprep.mubr.msk.f32.mxu1 %vm605_vm1, %v3641_v46  ;;  %2316 = vmatprep.mubr.msk.f32.mxu0 %vm605_vm1, %v3663_v49 }
 0x144   : > { %2400 = vmatprep.subr.bf16.mxu1 %v2399_v58  ;;  %v566_v29 = vsel %vm554_vm3, %v564_v5, %v565_v23 }
 0x145   : > { %2231 = vmatmul.mubr.msk.f32.gmra.mrb[2].mxu1 %vm605_vm1, %v3669_v1 }
 0x146   : > { %2317 = vmatmul.mubr.msk.f32.gmra.mrb[6].mxu0 %vm605_vm1, %v3672_v14  ;;  %2233 = vmatprep.mubr.msk.f32.mxu1 %vm605_vm1, %v3678_v4 }
 0x147   : > { %2327 = vmatprep.mubr.msk.f32.mxu0 %vm605_vm1, %v3678_v4  ;;  %2402 = vmatpush3.bf16.msra.mxu1 %v2399_v58 }
 0x148   : > { %2404 = vmatprep.subr.bf16.mxu1 %v2403_v9 }
 0x149   : > { %2234 = vmatmul.mubr.msk.f32.gmra.mrb[4].mxu1 %vm605_vm1, %v3697_v15 }
 0x14a   : > { %2328 = vmatmul.mubr.msk.f32.vlgmr.msra.gmra.mrb[0].mxu0 %vm605_vm1, %v3697_v15  ;;  %2236 = vmatprep.mubr.msk.f32.mxu1 %vm605_vm1, %v3701_v24 }
 0x14b   : > { %2438 = vmatpush3.bf16.msra.mxu0 %v2435_v43  ;;  %2330 = vmatprep.mubr.msk.f32.mxu0 %vm605_vm1, %v3701_v24  ;;  %v1373_v43 = vrot.slane %v3722_v33, 7 }
 0x14c   : > { %2440 = vmatprep.subr.bf16.mxu0 %v2439_v52 }
 0x14d   : > { %2237 = vmatmul.mubr.msk.f32.gmra.mrb[6].mxu1 %vm605_vm1, %v566_v29  ;;  %v1374_v48 = vsel %vm554_vm3, %v1372_v34, %v1373_v43 }
 0x14e   : > { %2331 = vmatmul.mubr.msk.f32.gmra.mrb[2].mxu0 %vm605_vm1, %v566_v29  ;;  %2247 = vmatprep.mubr.msk.f32.mxu1 %vm605_vm1, %v578_v31 }
 0x14f   : > { %2333 = vmatprep.mubr.msk.f32.mxu0 %vm605_vm1, %v996_v32  ;;  %2442 = vmatpush3.bf16.msra.mxu0 %v2439_v52 }
 0x150   : > { %2444 = vmatprep.subr.bf16.mxu0 %v2443_v39 }
 0x151   : > { %2248 = vmatmul.mubr.msk.f32.vlgmr.msra.gmra.mrb[0].mxu1 %vm605_vm1, %v592_v41 }
 0x152   : > { %2334 = vmatmul.mubr.msk.f32.gmra.mrb[4].mxu0 %vm605_vm1, %v994_v42  ;;  %2406 = vmatpush3.bf16.msra.mxu1 %v2403_v9 }
 0x153   : > { %2250 = vmatprep.mubr.msk.f32.mxu1 %vm605_vm1, %v3584_v6  ;;  %2336 = vmatprep.mubr.msk.f32.mxu0 %vm605_vm1, %v1376_v45  ;;  %v2447_v6 = vpack.c.bf16 %v1631_v54, %v1630_v51 }
 0x154   : > { %2408 = vmatprep.subr.bf16.mxu1 %v2407_v44 }
 0x155   : > { %2251 = vmatmul.mubr.msk.f32.gmra.mrb[2].mxu1 %vm605_vm1, %v3595_v17 }
 0x156   : > { %2337 = vmatmul.mubr.msk.f32.gmra.mrb[6].mxu0 %vm605_vm1, %v1374_v48  ;;  %2253 = vmatprep.mubr.msk.f32.mxu1 %vm605_vm1, %v3605_v22 }
 0x157   : > { %2347 = vmatprep.mubr.msk.f32.mxu0 %vm605_vm1, %v3568_v60  ;;  %2410 = vmatpush3.bf16.msra.mxu1 %v2407_v44  ;;  %v1378_v60 = vrot.slane %v3722_v33, 1 }
 0x158   : > { %2451 = vmatprep.subr.bf16.mxu1 %v3516_v7 }
 0x159   : > { %2254 = vmatmul.mubr.msk.f32.gmra.mrb[4].mxu1 %vm605_vm1, %v3622_v35 }
 0x15a   : > { %2348 = vmatmul.mubr.msk.f32.vlgmr.msra.gmra.mrb[0].mxu0 %vm605_vm1, %v3570_v61  ;;  %2256 = vmatprep.mubr.msk.f32.mxu1 %vm605_vm1, %v3630_v38  ;;  %v1381_v61 = vsel %vm575_vm2, %v1378_v60, 0.0 }
 0x15b   : > { %2446 = vmatpush3.bf16.msra.mxu0 %v2443_v39  ;;  %2350 = vmatprep.mubr.msk.f32.mxu0 %vm605_vm1, %v3597_v18 }
 0x15c   : > { %2448 = vmatprep.subr.bf16.mxu0 %v2447_v6 }
 0x15d   : > { %2257 = vmatmul.mubr.msk.f32.gmra.mrb[6].mxu1 %vm605_vm1, %v3649_v50 }
 0x15e   : > { %2351 = vmatmul.mubr.msk.f32.gmra.mrb[2].mxu0 %vm605_vm1, %v3599_v19  ;;  %2267 = vmatprep.mubr.msk.f32.mxu1 %vm605_vm1, %v3641_v46 }
 0x15f   : > { %2353 = vmatprep.mubr.msk.f32.mxu0 %vm605_vm1, %v3633_v40  ;;  %2450 = vmatpush3.bf16.msra.mxu0 %v2447_v6 }
 0x161   : > { %2268 = vmatmul.mubr.msk.f32.vlgmr.msra.gmra.mrb[0].mxu1 %vm605_vm1, %v3669_v1 }
 0x162   : > { %2354 = vmatmul.mubr.msk.f32.gmra.mrb[4].mxu0 %vm605_vm1, %v3643_v47  ;;  %2453 = vmatpush3.bf16.msra.mxu1 %v3516_v7  ;;  %v1377_v7 = vrot.slane %v3710_v53, 1 }
 0x163   : > { %2270 = vmatprep.mubr.msk.f32.mxu1 %vm605_vm1, %v3678_v4  ;;  %2356 = vmatprep.mubr.msk.f32.mxu0 %vm605_vm1, %v3710_v53 }
 0x164   : > { %2452 = vmatprep.subr.bf16.mxu1 %v3518_v12 }
 0x165   : > { %2271 = vmatmul.mubr.msk.f32.gmra.mrb[2].mxu1 %vm605_vm1, %v3697_v15 }
 0x166   : > { %2357 = vmatmul.mubr.msk.f32.gmra.mrb[6].mxu0 %vm605_vm1, %v3722_v33  ;;  %2273 = vmatprep.mubr.msk.f32.mxu1 %vm605_vm1, %v3701_v24 }
 0x167   : > { %2367 = vmatprep.mubr.msk.f32.mxu0 %vm605_vm1, %v3605_v22  ;;  %2454 = vmatpush3.bf16.msra.mxu1 %v3518_v12  ;;  %v1379_v12 = vsel %vm575_vm2, %v1377_v7, %v1378_v60 }
 0x169   : > { %2274 = vmatmul.mubr.msk.f32.gmra.mrb[4].mxu1 %vm605_vm1, %v566_v29 }
 0x16a   : > { %2368 = vmatmul.mubr.msk.f32.vlgmr.msra.gmra.mrb[0].mxu0 %vm605_vm1, %v3622_v35  ;;  %2276 = vmatprep.mubr.msk.f32.mxu1 %vm605_vm1, %v996_v32 }
 0x16b   : > { %2370 = vmatprep.mubr.msk.f32.mxu0 %vm605_vm1, %v3630_v38 }
 0x16d   : > { %2277 = vmatmul.mubr.msk.f32.gmra.mrb[6].mxu1 %vm605_vm1, %v994_v42 }
 0x16e   : > { %2371 = vmatmul.mubr.msk.f32.gmra.mrb[2].mxu0 %vm605_vm1, %v3649_v50  ;;  %2293 = vmatprep.mubr.msk.f32.mxu1 %vm605_vm1, %v3597_v18 }
 0x16f   : > { %2373 = vmatprep.mubr.msk.f32.mxu0 %vm605_vm1, %v3663_v49 }
 0x171   : > { %2294 = vmatmul.mubr.msk.f32.vlgmr.msra.gmra.mrb[4].mxu1 %vm605_vm1, %v3599_v19 }
 0x172   : > { %2374 = vmatmul.mubr.msk.f32.gmra.mrb[4].mxu0 %vm605_vm1, %v3672_v14  ;;  %2296 = vmatprep.mubr.msk.f32.mxu1 %vm605_vm1, %v3633_v40 }
 0x173   : > { %2376 = vmatprep.mubr.msk.f32.mxu0 %vm605_vm1, %v1379_v12 }
 0x175   : > { %2297 = vmatmul.mubr.msk.f32.gmra.mrb[6].mxu1 %vm605_vm1, %v3643_v47 }
 0x176   : > { %2377 = vmatmul.mubr.msk.f32.gmra.mrb[6].mxu0 %vm605_vm1, %v1381_v61 }
 0x234   : > { %v2269_v17 = vpop.f32.mrb[0].mxu1 }
 0x235   : > { %v1078_v18 = vpop.f32.mrb[1].mxu1 }
 0x238   : > { %v2272_v19 = vpop.f32.mrb[2].mxu1 }
 0x239   : > { %v1088_v22 = vpop.f32.mrb[3].mxu1 }
 0x23d   : > { %v2369_v35 = vpop.f32.mrb[0].mxu0 }
 0x23e   : > { %v2455_v38 = vadd.f32 %v2369_v35, %v2269_v17  ;;  %v1703_v40 = vpop.f32.mrb[1].mxu0 }
 0x23f   : > { %v2456_v46 = vadd.f32 %v1703_v40, %v1078_v18 }
 0x240   : > { %1752 = vst.msk [vmem:[%s3810_s22 + $0x8] sm:$0xff] %vm1750_vm5, %v2455_v38 }
 0x241   : > { %1751 = vst.msk [vmem:[%s3810_s22] sm:$0xff] %vm1750_vm5, %v2456_v46  ;;  %v2372_v47 = vpop.f32.mrb[2].mxu0 }
 0x242   : > { %v2457_v50 = vadd.f32 %v2372_v47, %v2272_v19  ;;  %v1713_v55 = vpop.f32.mrb[3].mxu0 }
 0x243   : > { %v2458_v56 = vadd.f32 %v1713_v55, %v1088_v22 }
 0x244   : > { %1754 = vst.msk [vmem:[%s3810_s22 + $0x18] sm:$0xff] %vm1750_vm5, %v2457_v50  ;;  %v2295_v57 = vpop.f32.mrb[4].mxu1 }
 0x245   : > { %1753 = vst.msk [vmem:[%s3810_s22 + $0x10] sm:$0xff] %vm1750_vm5, %v2458_v56  ;;  %v2375_v58 = vpop.f32.mrb[4].mxu0  ;;  %v1220_v49 = vpop.f32.mrb[5].mxu1 }
 0x246   : > { %v2459_v59 = vadd.f32 %v2375_v58, %v2295_v57  ;;  %v1723_v62 = vpop.f32.mrb[5].mxu0 }
 0x247   : > { %v2460_v63 = vadd.f32 %v1723_v62, %v1220_v49 }
 0x248   : > { %1756 = vst.msk [vmem:[%s3810_s22 + $0x28] sm:$0xff] %vm1750_vm5, %v2459_v59  ;;  %v2298_v0 = vpop.f32.mrb[6].mxu1 }
 0x249   : > { %1755 = vst.msk [vmem:[%s3810_s22 + $0x20] sm:$0xff] %vm1750_vm5, %v2460_v63  ;;  %v2378_v1 = vpop.f32.mrb[6].mxu0  ;;  %v1230_v2 = vpop.f32.mrb[7].mxu1 }
 0x24a   : > { %v2461_v14 = vadd.f32 %v2378_v1, %v2298_v0  ;;  %v1733_v3 = vpop.f32.mrb[7].mxu0 }
 0x24b   : > { %v2462_v4 = vadd.f32 %v1733_v3, %v1230_v2 }
 0x24c   : > { %1758 = vst.msk [vmem:[%s3810_s22 + $0x38] sm:$0xff] %vm1750_vm5, %v2461_v14 }
 0x24d   : > { %1757 = vst.msk [vmem:[%s3810_s22 + $0x30] sm:$0xff] %vm1750_vm5, %v2462_v4 }
 0x24e   : > { %2879 = shalt.err (!%p2876_p13)
}
 0x24f   : > { %s2880_s16 = scalar_lea.hbm %s3830_s1, 1024  ;;  %s2884_s3 = scalar_lea.hbm %s4028_s2, 8192 }
 0x250   : > { %p2881_p11 = scmp.ne.s32.totalorder %s3830_s1, %s2880_s16  ;;  %p2885_p3 = scmp.lt.u32.totalorder %s3830_s1, %s4028_s2 }
 0x251   : > { %p2886_p12 = scmp.lt.u32.totalorder %s2884_s3, %s2880_s16  ;;  %p2888_p5 = scmp.lt.u32.totalorder %s2880_s16, %s3830_s1 }
 0x252   : > { %p2882_p0 = pnand %p2881_p11, %p4029_p10 }
 0x253   : > { %p2887_p4 = por %p2886_p12, %p2885_p3 }
 0x254   : > { %p2883_p1 = pneg %p2882_p0 }
 0x255   : > { %p2889_p8 = por %p2888_p5, %p2887_p4 }
 0x257   : > { %p2890_p2 = pnand %p2889_p8, %p2883_p1 }
 0x259   : > { %2893 = shalt.err (!%p2890_p2)
}
 0x25a   : > { %s3041_s4 = smov 128   ;;  %s3042_s5 = smov 8  }
 0x25b   : > { %2537 = dma.vmem_to_hbm [thread:$0]  (%p4029_p10), %s3832_s17, 1024, %s3830_s1, %s1760_s9, %s3041_s4, %s3041_s4, %s3042_s5  }
 0x25c PF: > { %p2570_p9 = scmp.ge.s32.totalorder %s3028_s10, 2  ;;  %s1791_s8 = sand.u32 1, %s3000_s27  }
 0x25d   : > { %p4030_p7 = scmp.ne.s32.totalorder %s3992_s30, 0  ;;  %s1792_s0 = scalar_lea.sflag [#allocation4], %s1791_s8 }
 0x25f   : > { %p2560_p6 = pnand %p2570_p9, %p4030_p7 }
 0x261   : > { %2971 = dma.done.wait (!%p2560_p6), %s1792_s0, 1024  }
 0x262   : > { %2973 = vsyncadd (!%p2560_p6), %s1792_s0, 4294966272  ;;  %s27_s10 = sadd.s32 1, %s3028_s10   ;;  %s4032_s21 = sld [smem:[#allocation21_spill]] }
 0x263   : > { %p3867_p13 = scmp.ge.s32.totalorder %s27_s10, 10   ;;  %s4033_s22 = sld [smem:[#allocation22_spill]] }
 0x264   : > { %s4034_s15 = sld [smem:[#allocation23_spill]]  ;;  %s4035_s17 = smov %s3237_s24 }
 0x265   : > { %s4036_s14 = sld [smem:[#allocation34_spill]]  ;;  %s4037_s30 = sld [smem:[#allocation26_spill]] }
 0x266   : > { %s4038_s1 = sld [smem:[#allocation27_spill]]  ;;  %s4039_s8 = sld [smem:[#allocation29_spill]] }
 0x267   : > { %s4040_s9 = sld [smem:[#allocation30_spill]]  ;;  %s4041_s23 = smov %s4064_s7 }
 0x268   : > { %s4043_s25 = smov %s2996_s26  ;;  %s4044_s26 = smov %s4035_s17 }
 0x269   : > { %s4045_s27 = smov %s3004_s28  ;;  %s4046_s28 = smov %s3008_s29 }
 0x26a   : > { %s4042_s24 = smov %s4034_s15  ;;  %26 = sbr.rel (!%p3867_p13) target bundleno = 22 (0x16), region = 133 }
 0x26b   : > { %s4047_s29 = smov %s4036_s14 }
 0x26c   : > { %s4048_s7 = smov %s4038_s1 }
 0x271   :  { %1797 = vsyncpa [#allocation3], 1 }
 0x272   :  { %1799 = vsyncpa [#allocation3 + $0x1], 1 }
 0x273   :  { %1800 = vsyncpa [#allocation6], 1 }
 0x274   :  { %1802 = vsyncpa [#allocation6 + $0x1], 1 }
 0x275   :  { %1803 = vsyncpa [#allocation9], 1 }
 0x276   :  { %1804 = vsyncpa [#allocation12], 1 }
 0x277   :  { %1805 = vsyncpa [#allocation4], 1 }
 0x278   :  { %1807 = vsyncpa [#allocation4 + $0x1], 1 }

</bundles_post_ra>
